<compile_context>
chip_gen: v7x
topology: tpu7x:2x2x1
jax: 0.10.0
libtpu: 0.0.40
codegen_flags: <defaults>
</compile_context>

<pallas_src>
import jax
import jax.numpy as jnp
import numpy as np
from jax.experimental import pallas as pl
from jax.experimental.pallas import tpu as pltpu

EPS = 1e-8
PAIR_DTYPE = jnp.bfloat16   # HBM / MXU dtype for the pair stream (f32 accumulate)


# ------------------------------- kernel ------------------------------------

def gvc_encoder_kernel(pos0_ref, feat0_ref, pair_ref, mj_ref, mi_ref,
                       inv_ref, scal_ref,                          # SMEM
                       ws_ij_ref, ws_p_ref, ws_n_ref, wsvbs_ref,   # per-layer weights
                       feat_out_ref, pos_out_ref,
                       feat_buf, pos_buf, s_buf):
    n = pl.program_id(0)
    layer = pl.program_id(1)
    t = pl.program_id(2)

    L = feat0_ref.shape[1]
    D = feat0_ref.shape[2]
    TILE = feat_out_ref.shape[1]
    T = L // TILE
    P = pair_ref.shape[3]
    M = TILE * L

    src = layer % 2                 # ping-pong slot holding this layer's input state
    dst = 1 - src

    # ---- (layer 0, tile 0): load the initial node state into ping-pong slot 0
    @pl.when(jnp.logical_and(layer == 0, t == 0))
    def _():
        feat_buf[pl.ds(0, T)] = feat0_ref[0].reshape(T, TILE, D)
        pos_buf[pl.ds(0, T)] = pos0_ref[0].reshape(T, TILE, 3)

    # ---- once per (n, layer): hoisted per-node scalar projection ------------
    #      cols [:D] = feat @ ws_i (i-role), cols [D:] = feat @ ws_j (j-role)
    @pl.when(t == 0)
    def _():
        feat_all = feat_buf[pl.ds(src * T, T)].reshape(L, D)
        s_buf[...] = jnp.dot(feat_all, ws_ij_ref[0],
                             preferred_element_type=jnp.float32).reshape(T, TILE, 2 * D)

    # ---- per-tile node state -------------------------------------------------
    pi = pos_buf[src * T + t]                                 # [TILE, 3]
    pj = pos_buf[pl.ds(src * T, T)].reshape(L, 3)             # [L, 3]
    si = s_buf[t][:, :D]                                      # [TILE, D]
    sj = s_buf[...].reshape(L, 2 * D)[:, D:]                  # [L, D]

    wsvbs = wsvbs_ref[0]                                      # [2, D]
    wsv_row = wsvbs[0:1, :]                                   # [1, D]
    bs_row = wsvbs[1:2, :]                                    # [1, D]
    wsn = ws_n_ref[0]                                         # [3, D]

    # ---- per-edge scalar path: pair MXU dot, no lane-dim concats -------------
    pair = pair_ref[0].reshape(M, P)                          # bf16, collapse leading dims
    s_pv = jnp.dot(pair, ws_p_ref[0],
                   preferred_element_type=jnp.float32)        # [M, D]
    s_pre = (s_pv.reshape(TILE, L, D)
             + si[:, None, :] + sj[None, :, :] + bs_row[None, :, :])

    # ---- GVP vector norms via the expansion ||a*pi + b*pj||^2 ----------------
    pii = jnp.sum(pi[:, None, :] * pi[:, None, :], axis=-1, keepdims=True)  # [TILE,1,1]
    pjj = jnp.sum(pj[None, :, :] * pj[None, :, :], axis=-1, keepdims=True)  # [1,L,1]
    pij = jnp.sum(pi[:, None, :] * pj[None, :, :], axis=-1, keepdims=True)  # [TILE,L,1]
    for h in range(3):
        a = scal_ref[layer, h]
        b = scal_ref[layer, 3 + h]
        vn_h = jnp.sqrt(jnp.maximum(a * a * pii + 2.0 * a * b * pij + b * b * pjj, EPS))
        s_pre = s_pre + vn_h * wsn[h:h + 1, :][None, :, :]    # broadcast FMA (no concat)

    # ---- vector gate: VPU multiply + lane reduce (no N=1 MXU matvec) ---------
    bsv = scal_ref[layer, 8]
    gate = jnp.sum(jax.nn.sigmoid(s_pre) * wsv_row[None, :, :],
                   axis=-1, keepdims=True) + bsv              # [TILE, L, 1]
    sg = jax.nn.sigmoid(gate)
    feat_upd = jnp.maximum(s_pre, 0.0)                        # scalar_act = relu

    # ---- masked j-reduction: mask-multiply + sublane sums (no M=1 einsum) ----
    mjb = mj_ref[0][None, :, :]                               # [1, L, 1]
    feat_red = jnp.sum(feat_upd * mjb, axis=1)                # [TILE, D]
    sgm = sg * mjb                                            # [TILE, L, 1]
    s_sum = jnp.sum(sgm, axis=1)                              # [TILE, 1]
    pj_red = jnp.sum(sgm * pj[None, :, :], axis=1)            # [TILE, 3]

    ca = scal_ref[layer, 6]
    cb = scal_ref[layer, 7]
    scale = mi_ref[0] * inv_ref[n]                            # m_i / node_num   [TILE, 1]
    feat_new = feat_red * scale                               # [TILE, D]
    pos_new = (ca * pi * s_sum + cb * pj_red) * scale         # [TILE, 3]

    # ---- next-layer state + outputs ------------------------------------------
    feat_buf[dst * T + t] = feat_new
    pos_buf[dst * T + t] = pos_new
    feat_out_ref[0] = feat_new
    pos_out_ref[0] = pos_new


# ------------------------------- wrapper ------------------------------------

def _round_up(x, m):
    return ((x + m - 1) // m) * m


def _pick_tile_and_vmem(L, D, P):
    """Generation-aware tile choice with honest VMEM accounting (lane padding +
    f32 intermediates), per the review.  Prefers tile_i == L so the per-n pair
    slab stays resident in VMEM across all fused layers."""
    try:
        cap = int(getattr(pltpu.get_tpu_info(), "vmem_capacity_bytes", 64 << 20))
    except Exception:
        cap = 64 << 20                      # conservative fallback (v7x per-core)
    budget = int(cap * 0.70)                # ~45 MiB on v7x, ~90 MiB on v5e/v6e
    lanes = 128

    def vmem_need(tile):
        # pair block [tile, L, P] bf16: P-minor is lane-padded to 128 and the
        # second-minor to the bf16 sublane tile (16); x2 for double buffering.
        pair_blk = tile * _round_up(L, 16) * lanes * 2
        pair_bufs = 2 * pair_blk
        # live f32 intermediates (s_pre, feat_upd, sigmoid product, sgm*pj, ...)
        inter = 5 * tile * L * _round_up(D, lanes) * 4
        # resident scratch: feat/pos ping-pong + per-layer node projection
        scratch = (2 * L * _round_up(D, lanes) + 2 * L * lanes
                   + L * _round_up(2 * D, lanes)) * 4
        slack = 2 << 20                     # weights, outputs, compiler scratch
        return pair_bufs + inter + scratch + slack

    cands = [L] + [c for c in (1024, 512, 256, 128, 64, 32, 16, 8)
                   if c < L and L % c == 0]
    tile = cands[-1]
    for c in cands:
        if vmem_need(c) <= budget:
            tile = c
            break
    vmem_limit = int(min(budget, max(32 << 20, 2 * vmem_need(tile))))
    return tile, vmem_limit


def gvc_encoder_forward(pos, node_feat, pair_feat, mask, params):
    """Full GVCEncoder forward (all layers fused into one pallas_call)."""
    N, L, D = node_feat.shape
    P = pair_feat.shape[-1]
    n_layers = len(params)

    tile, vmem_limit = _pick_tile_and_vmem(L, D, P)
    T = L // tile

    pair_bf16 = pair_feat.astype(PAIR_DTYPE)                       # [N, L, L, P]
    mask_col = mask.reshape(N, L, 1).astype(jnp.float32)
    inv_num = (1.0 / jnp.maximum(jnp.sum(mask, axis=-1), 1.0)).astype(jnp.float32)

    # stacked per-layer weights (selected per grid step by the layer index)
    ws_ij_all = jnp.stack([p["ws_ij"] for p in params])            # [NL, D, 2D]
    ws_p_all = jnp.stack([p["ws_p"] for p in params])              # [NL, P, D] bf16
    ws_n_all = jnp.stack([p["ws_n"] for p in params])              # [NL, 3, D]
    wsvbs_all = jnp.stack([jnp.stack([p["wsv_row"], p["bs_row"]]) for p in params])  # [NL,2,D]
    scal_all = jnp.stack([p["scal"] for p in params])              # [NL, 9]

    smem = pl.BlockSpec(memory_space=pltpu.MemorySpace.SMEM)

    feat_out, pos_out = pl.pallas_call(
        gvc_encoder_kernel,
        out_shape=(jax.ShapeDtypeStruct((N, L, D), jnp.float32),
                   jax.ShapeDtypeStruct((N, L, 3), jnp.float32)),
        grid=(N, n_layers, T),
        in_specs=[
            pl.BlockSpec((1, L, 3), lambda n, l, t: (n, 0, 0)),          # initial pos
            pl.BlockSpec((1, L, D), lambda n, l, t: (n, 0, 0)),          # initial node_feat
            pl.BlockSpec((1, tile, L, P), lambda n, l, t: (n, t, 0, 0)), # pair (bf16); index
                                                                         # is layer-independent
                                                                         # -> resident when T==1
            pl.BlockSpec((1, L, 1), lambda n, l, t: (n, 0, 0)),          # mask over j
            pl.BlockSpec((1, tile, 1), lambda n, l, t: (n, t, 0)),       # mask over i
            smem,                                                        # inv_num (N,)
            smem,                                                        # scal_all (NL, 9)
            pl.BlockSpec((1, D, 2 * D), lambda n, l, t: (l, 0, 0)),      # ws_ij
            pl.BlockSpec((1, P, D), lambda n, l, t: (l, 0, 0)),          # ws_p (bf16)
            pl.BlockSpec((1, 3, D), lambda n, l, t: (l, 0, 0)),          # ws_n
            pl.BlockSpec((1, 2, D), lambda n, l, t: (l, 0, 0)),          # [wsv ; bs]
        ],
        out_specs=(pl.BlockSpec((1, tile, D), lambda n, l, t: (n, t, 0)),
                   pl.BlockSpec((1, tile, 3), lambda n, l, t: (n, t, 0))),
        scratch_shapes=[
            pltpu.VMEM((2 * T, tile, D), jnp.float32),    # node_feat ping-pong
            pltpu.VMEM((2 * T, tile, 3), jnp.float32),    # pos ping-pong
            pltpu.VMEM((T, tile, 2 * D), jnp.float32),    # per-layer node projection
        ],
        compiler_params=pltpu.CompilerParams(
            dimension_semantics=("parallel", "arbitrary", "arbitrary"),
            vmem_limit_bytes=vmem_limit),
    )(pos, node_feat, pair_bf16, mask_col, mask_col,
      inv_num, scal_all, ws_ij_all, ws_p_all, ws_n_all, wsvbs_all)

    return feat_out, pos_out


# ------------------------- parameter construction -------------------------

def make_layer_params(key, D, P):
    """Deterministic synthetic weights for one GVCBlock's GVP (vi=3, vo=1, h=3)."""
    si_dim = 2 * D + P
    h = 3
    ks = jax.random.split(key, 6)
    wh = jax.random.normal(ks[0], (h, 3), jnp.float32) * 0.5            # Linear(3 -> h), no bias
    ws = jax.random.normal(ks[1], (D, si_dim + h), jnp.float32) / np.sqrt(si_dim + h)
    bs = jax.random.normal(ks[2], (D,), jnp.float32) * 0.1
    wv = jax.random.normal(ks[3], (1, h), jnp.float32) * 0.5            # Linear(h -> 1), no bias
    wsv = jax.random.normal(ks[4], (1, D), jnp.float32) / np.sqrt(D)
    bsv = jax.random.normal(ks[5], (1,), jnp.float32) * 0.1

    # vector input channels are [pos_i, pos_j, pos_i - pos_j]  =>
    #   vh_h = (wh[h,0]+wh[h,2]) * pos_i + (wh[h,1]-wh[h,2]) * pos_j
    wa = wh[:, 0] + wh[:, 2]                    # (3,)
    wb = wh[:, 1] - wh[:, 2]                    # (3,)
    ca = jnp.sum(wv[0] * wa)                    # wv folded into pos_i coefficient
    cb = jnp.sum(wv[0] * wb)                    # wv folded into pos_j coefficient

    # ws input column order follows torch.cat([feat_i, feat_j, pair, vn], -1)
    ws_t = jnp.transpose(ws)                                            # (2D+P+3, D)
    ws_ij = jnp.concatenate([ws_t[:D, :], ws_t[D:2 * D, :]], axis=1)    # (D, 2D)
    ws_p = ws_t[2 * D:2 * D + P, :].astype(PAIR_DTYPE)                  # (P, D)
    ws_n = ws_t[2 * D + P:, :]                                          # (3, D), f32

    scal = jnp.concatenate([wa, wb, jnp.stack([ca, cb, bsv[0]])])       # (9,)

    return {
        "ws_ij": ws_ij, "ws_p": ws_p, "ws_n": ws_n,
        "wsv_row": wsv[0], "bs_row": bs, "scal": scal,
        # raw weights for the pure-JAX reference
        "wh": wh, "_ws_full": ws, "_wv_full": wv, "wsv": wsv,
        "bs": bs[None, :], "bsv": bsv,
    }


# ----------------------------- pure-JAX reference --------------------------

def ref_block(pos, feat, pair, mask, p):
    hp = jax.lax.Precision.HIGHEST
    N, L, D = feat.shape
    mask_pair = mask[:, :, None] * mask[:, None, :]
    feat_i = jnp.broadcast_to(feat[:, :, None, :], (N, L, L, D))
    feat_j = jnp.broadcast_to(feat[:, None, :, :], (N, L, L, D))
    s = jnp.concatenate([feat_i, feat_j, pair], axis=-1)
    pos_i = jnp.broadcast_to(pos[:, :, None, :], (N, L, L, 3))
    pos_j = jnp.broadcast_to(pos[:, None, :, :], (N, L, L, 3))
    v = jnp.stack([pos_i, pos_j, pos_i - pos_j], axis=-2)               # (...,3 ch,3 xyz)
    v_t = jnp.swapaxes(v, -1, -2)                                       # (...,3 xyz,3 ch)
    vh = jnp.einsum('...ck,hk->...ch', v_t, p["wh"], precision=hp)
    vn = jnp.sqrt(jnp.maximum(jnp.sum(vh * vh, axis=-2), EPS))          # (...,h)
    s_cat = jnp.concatenate([s, vn], axis=-1)
    s_out = jnp.einsum('...k,ok->...o', s_cat, p["_ws_full"], precision=hp) + p["bs"][0]
    v_o = jnp.einsum('...ch,oh->...co', vh, p["_wv_full"], precision=hp)
    v_o = jnp.swapaxes(v_o, -1, -2)                                     # (...,1,3)
    gate = jnp.einsum('...o,go->...g', jax.nn.sigmoid(s_out), p["wsv"], precision=hp) + p["bsv"]
    v_o = v_o * jax.nn.sigmoid(gate)[..., None]
    s_out = jax.nn.relu(s_out)
    node_num = jnp.maximum(jnp.sum(mask, axis=1), 1.0)[:, None, None]
    feat_out = jnp.sum(s_out * mask_pair[..., None], axis=2) / node_num
    pos_out = jnp.sum(v_o[..., 0, :] * mask_pair[..., None], axis=2) / node_num
    return feat_out, pos_out


def ref_encoder(pos, feat, pair, mask, params):
    for p in params:
        feat, pos = ref_block(pos, feat, pair, mask, p)
    return feat, pos


# ----------------------------------- main -----------------------------------

if __name__ == "__main__":
    N, L, D, P = 2, 8, 32, 8
    NUM_LAYERS = 3   # small for the demo; GVCEncoder default is 6

    key = jax.random.PRNGKey(0)
    k_pos, k_feat, k_pair, k_params = jax.random.split(key, 4)

    pos = jax.random.normal(k_pos, (N, L, 3), jnp.float32)
    node_feat = jax.random.normal(k_feat, (N, L, D), jnp.float32)
    pair_feat = jax.random.normal(k_pair, (N, L, L, P), jnp.float32)
    # binary mask: batch 0 fully valid, batch 1 has 5 valid nodes
    lens = jnp.array([L, 5], dtype=jnp.int32)
    mask = (jnp.arange(L)[None, :] < lens[:, None]).astype(jnp.float32)

    layer_keys = jax.random.split(k_params, NUM_LAYERS)
    params = [make_layer_params(layer_keys[i], D, P) for i in range(NUM_LAYERS)]

    feat_out, pos_out = jax.jit(
        lambda po, nf, pf, m: gvc_encoder_forward(po, nf, pf, m, params)
    )(pos, node_feat, pair_feat, mask)
    jax.block_until_ready((feat_out, pos_out))

    # the kernel streams pair_feat in bf16; feed the reference the identically
    # quantized pair tensor so the comparison isolates kernel math
    pair_q = pair_feat.astype(PAIR_DTYPE).astype(jnp.float32)
    feat_ref, pos_ref = ref_encoder(pos, node_feat, pair_q, mask, params)
    jax.block_until_ready((feat_ref, pos_ref))

    assert feat_out.shape == (N, L, D) and pos_out.shape == (N, L, 3)
    assert np.all(np.isfinite(np.asarray(feat_out)))
    assert np.all(np.isfinite(np.asarray(pos_out)))
    np.testing.assert_allclose(np.asarray(feat_out), np.asarray(feat_ref),
                               rtol=2e-2, atol=2e-2)
    np.testing.assert_allclose(np.asarray(pos_out), np.asarray(pos_ref),
                               rtol=2e-2, atol=2e-2)

    print("KERNEL_OK")
</pallas_src>

<mosaic_0001>
module attributes {stable_mosaic.version = 11 : i64} {
  func.func @gvc_encoder_kernel(%arg0: i32, %arg1: i32, %arg2: i32, %arg3: memref<1x8x3xf32, #tpu.memory_space<vmem>>, %arg4: memref<1x8x32xf32, #tpu.memory_space<vmem>>, %arg5: memref<1x8x8x8xbf16, #tpu.memory_space<vmem>>, %arg6: memref<1x8x1xf32, #tpu.memory_space<vmem>>, %arg7: memref<1x8x1xf32, #tpu.memory_space<vmem>>, %arg8: memref<2xf32, #tpu.memory_space<smem>>, %arg9: memref<3x9xf32, #tpu.memory_space<smem>>, %arg10: memref<1x32x64xf32, #tpu.memory_space<vmem>>, %arg11: memref<1x8x32xbf16, #tpu.memory_space<vmem>>, %arg12: memref<1x3x32xf32, #tpu.memory_space<vmem>>, %arg13: memref<1x2x32xf32, #tpu.memory_space<vmem>>, %arg14: memref<1x8x32xf32, #tpu.memory_space<vmem>>, %arg15: memref<1x8x3xf32, #tpu.memory_space<vmem>>, %arg16: memref<2x8x32xf32, #tpu.memory_space<vmem>>, %arg17: memref<2x8x3xf32, #tpu.memory_space<vmem>>, %arg18: memref<1x8x64xf32, #tpu.memory_space<vmem>>) attributes {dimension_semantics = [#tpu.dimension_semantics<parallel>, #tpu.dimension_semantics<arbitrary>, #tpu.dimension_semantics<arbitrary>], iteration_bounds = array<i64: 2, 3, 1>, scalar_prefetch = 0 : i64, scratch_operands = 3 : i64, tpu.core_type = #tpu.core_type<tc>, window_params = [{transform_indices = @transform_0, window_bounds = array<i64: 1, 8, 3>}, {transform_indices = @transform_1, window_bounds = array<i64: 1, 8, 32>}, {transform_indices = @transform_2, window_bounds = array<i64: 1, 8, 8, 8>}, {transform_indices = @transform_3, window_bounds = array<i64: 1, 8, 1>}, {transform_indices = @transform_4, window_bounds = array<i64: 1, 8, 1>}, {transform_indices = @transform_5, window_bounds = array<i64: 2>}, {transform_indices = @transform_6, window_bounds = array<i64: 3, 9>}, {transform_indices = @transform_7, window_bounds = array<i64: 1, 32, 64>}, {transform_indices = @transform_8, window_bounds = array<i64: 1, 8, 32>}, {transform_indices = @transform_9, window_bounds = array<i64: 1, 3, 32>}, {transform_indices = @transform_10, window_bounds = array<i64: 1, 2, 32>}, {transform_indices = @transform_11, window_bounds = array<i64: 1, 8, 32>}, {transform_indices = @transform_12, window_bounds = array<i64: 1, 8, 3>}]} {
    %c2_i32 = arith.constant 2 : i32
    %c0_i32 = arith.constant 0 : i32
    %0 = arith.cmpi eq, %c2_i32, %c0_i32 : i32
    %c1_i32 = arith.constant 1 : i32
    %1 = arith.select %0, %c1_i32, %c2_i32 : i32
    %2 = arith.remsi %arg1, %1 : i32
    %c0_i32_0 = arith.constant 0 : i32
    %3 = arith.cmpi ne, %2, %c0_i32_0 : i32
    %c0_i32_1 = arith.constant 0 : i32
    %4 = arith.cmpi slt, %2, %c0_i32_1 : i32
    %c0_i32_2 = arith.constant 0 : i32
    %5 = arith.cmpi slt, %1, %c0_i32_2 : i32
    %6 = arith.xori %4, %5 : i1
    %7 = arith.andi %6, %3 : i1
    %8 = arith.addi %2, %1 : i32
    %9 = arith.select %7, %8, %2 : i32
    %c1_i32_3 = arith.constant 1 : i32
    %10 = arith.subi %c1_i32_3, %9 : i32
    %c0_i32_4 = arith.constant 0 : i32
    %11 = arith.cmpi eq, %arg1, %c0_i32_4 : i32
    %c0_i32_5 = arith.constant 0 : i32
    %12 = arith.cmpi eq, %arg2, %c0_i32_5 : i32
    %13 = arith.andi %11, %12 : i1
    %14 = arith.extui %13 : i1 to i32
    %c0_i32_6 = arith.constant 0 : i32
    %15 = arith.cmpi ne, %14, %c0_i32_6 : i32
    scf.if %15 {
      %c0_67 = arith.constant 0 : index
      %c0_68 = arith.constant 0 : index
      %c0_69 = arith.constant 0 : index
      %229 = vector.load %arg4[%c0_67, %c0_68, %c0_69] : memref<1x8x32xf32, #tpu.memory_space<vmem>>, vector<1x8x32xf32>
      %230 = vector.shape_cast %229 : vector<1x8x32xf32> to vector<8x32xf32>
      %231 = vector.shape_cast %230 : vector<8x32xf32> to vector<1x8x32xf32>
      %c0_70 = arith.constant 0 : index
      %c0_71 = arith.constant 0 : index
      %c0_72 = arith.constant 0 : index
      %232 = vector.load %arg16[%c0_70, %c0_71, %c0_72] : memref<2x8x32xf32, #tpu.memory_space<vmem>>, vector<1x8x32xf32>
      tpu.vector_store %arg16[%c0_70, %c0_71, %c0_72], %231 {strides = array<i32>} : memref<2x8x32xf32, #tpu.memory_space<vmem>>, vector<1x8x32xf32>,
      %c0_73 = arith.constant 0 : index
      %c0_74 = arith.constant 0 : index
      %c0_75 = arith.constant 0 : index
      %233 = vector.load %arg3[%c0_73, %c0_74, %c0_75] : memref<1x8x3xf32, #tpu.memory_space<vmem>>, vector<1x8x3xf32>
      %234 = vector.shape_cast %233 : vector<1x8x3xf32> to vector<8x3xf32>
      %235 = vector.shape_cast %234 : vector<8x3xf32> to vector<1x8x3xf32>
      %c0_76 = arith.constant 0 : index
      %c0_77 = arith.constant 0 : index
      %c0_78 = arith.constant 0 : index
      %236 = vector.load %arg17[%c0_76, %c0_77, %c0_78] : memref<2x8x3xf32, #tpu.memory_space<vmem>>, vector<1x8x3xf32>
      tpu.vector_store %arg17[%c0_76, %c0_77, %c0_78], %235 {strides = array<i32>} : memref<2x8x3xf32, #tpu.memory_space<vmem>>, vector<1x8x3xf32>,
    } else {
    }
    %c0_i32_7 = arith.constant 0 : i32
    %16 = arith.cmpi eq, %arg2, %c0_i32_7 : i32
    %17 = arith.extui %16 : i1 to i32
    %c0_i32_8 = arith.constant 0 : i32
    %18 = arith.cmpi ne, %17, %c0_i32_8 : i32
    scf.if %18 {
      %c1_i32_67 = arith.constant 1 : i32
      %229 = arith.muli %9, %c1_i32_67 : i32
      %230 = arith.index_cast %229 : i32 to index
      %c0_68 = arith.constant 0 : index
      %c0_69 = arith.constant 0 : index
      %231 = vector.load %arg16[%230, %c0_68, %c0_69] : memref<2x8x32xf32, #tpu.memory_space<vmem>>, vector<1x8x32xf32>
      %232 = vector.shape_cast %231 : vector<1x8x32xf32> to vector<8x32xf32>
      %c0_70 = arith.constant 0 : index
      %c0_71 = arith.constant 0 : index
      %c0_72 = arith.constant 0 : index
      %233 = vector.load %arg10[%c0_70, %c0_71, %c0_72] : memref<1x32x64xf32, #tpu.memory_space<vmem>>, vector<1x32x64xf32>
      %234 = vector.shape_cast %233 : vector<1x32x64xf32> to vector<32x64xf32>
      %cst_73 = arith.constant dense<0.000000e+00> : vector<8x64xf32>
      %235 = tpu.matmul %232, %234, %cst_73 {dimension_numbers = #tpu.dot_dimension_numbers<[1], [0], [0], [1], [0, 0, 1, 1], [], []>} : vector<8x32xf32>, vector<32x64xf32>, vector<8x64xf32> -> vector<8x64xf32>
      %236 = vector.shape_cast %235 : vector<8x64xf32> to vector<1x8x64xf32>
      %c0_74 = arith.constant 0 : index
      %c0_75 = arith.constant 0 : index
      %c0_76 = arith.constant 0 : index
      %237 = vector.load %arg18[%c0_74, %c0_75, %c0_76] : memref<1x8x64xf32, #tpu.memory_space<vmem>>, vector<1x8x64xf32>
      tpu.vector_store %arg18[%c0_74, %c0_75, %c0_76], %236 {strides = array<i32>} : memref<1x8x64xf32, #tpu.memory_space<vmem>>, vector<1x8x64xf32>,
    } else {
    }
    %c1_i32_9 = arith.constant 1 : i32
    %19 = arith.muli %9, %c1_i32_9 : i32
    %20 = arith.addi %19, %arg2 : i32
    %21 = arith.index_cast %20 : i32 to index
    %c0 = arith.constant 0 : index
    %c0_10 = arith.constant 0 : index
    %22 = vector.load %arg17[%21, %c0, %c0_10] : memref<2x8x3xf32, #tpu.memory_space<vmem>>, vector<1x8x3xf32>
    %23 = vector.shape_cast %22 : vector<1x8x3xf32> to vector<8x3xf32>
    %c1_i32_11 = arith.constant 1 : i32
    %24 = arith.muli %9, %c1_i32_11 : i32
    %25 = arith.index_cast %24 : i32 to index
    %c0_12 = arith.constant 0 : index
    %c0_13 = arith.constant 0 : index
    %26 = vector.load %arg17[%25, %c0_12, %c0_13] : memref<2x8x3xf32, #tpu.memory_space<vmem>>, vector<1x8x3xf32>
    %27 = vector.shape_cast %26 : vector<1x8x3xf32> to vector<8x3xf32>
    %28 = arith.index_cast %arg2 : i32 to index
    %c0_14 = arith.constant 0 : index
    %c0_15 = arith.constant 0 : index
    %29 = vector.load %arg18[%28, %c0_14, %c0_15] : memref<1x8x64xf32, #tpu.memory_space<vmem>>, vector<1x8x64xf32>
    %30 = vector.shape_cast %29 : vector<1x8x64xf32> to vector<8x64xf32>
    %31 = vector.extract_strided_slice %30 {offsets = [0, 0], sizes = [8, 32], strides = [1, 1]} : vector<8x64xf32> to vector<8x32xf32>
    %c0_16 = arith.constant 0 : index
    %c0_17 = arith.constant 0 : index
    %c0_18 = arith.constant 0 : index
    %32 = vector.load %arg18[%c0_16, %c0_17, %c0_18] : memref<1x8x64xf32, #tpu.memory_space<vmem>>, vector<1x8x64xf32>
    %33 = vector.shape_cast %32 : vector<1x8x64xf32> to vector<8x64xf32>
    %34 = vector.extract_strided_slice %33 {offsets = [0, 32], sizes = [8, 32], strides = [1, 1]} : vector<8x64xf32> to vector<8x32xf32>
    %c0_19 = arith.constant 0 : index
    %c0_20 = arith.constant 0 : index
    %c0_21 = arith.constant 0 : index
    %35 = vector.load %arg13[%c0_19, %c0_20, %c0_21] : memref<1x2x32xf32, #tpu.memory_space<vmem>>, vector<1x2x32xf32>
    %36 = vector.shape_cast %35 : vector<1x2x32xf32> to vector<2x32xf32>
    %37 = vector.extract_strided_slice %36 {offsets = [0, 0], sizes = [1, 32], strides = [1, 1]} : vector<2x32xf32> to vector<1x32xf32>
    %38 = vector.extract_strided_slice %36 {offsets = [1, 0], sizes = [1, 32], strides = [1, 1]} : vector<2x32xf32> to vector<1x32xf32>
    %c0_22 = arith.constant 0 : index
    %c0_23 = arith.constant 0 : index
    %c0_24 = arith.constant 0 : index
    %39 = vector.load %arg12[%c0_22, %c0_23, %c0_24] : memref<1x3x32xf32, #tpu.memory_space<vmem>>, vector<1x3x32xf32>
    %40 = vector.shape_cast %39 : vector<1x3x32xf32> to vector<3x32xf32>
    %c0_25 = arith.constant 0 : index
    %c0_26 = arith.constant 0 : index
    %c0_27 = arith.constant 0 : index
    %c0_28 = arith.constant 0 : index
    %41 = vector.load %arg5[%c0_25, %c0_26, %c0_27, %c0_28] : memref<1x8x8x8xbf16, #tpu.memory_space<vmem>>, vector<1x8x8x8xbf16>
    %42 = vector.shape_cast %41 : vector<1x8x8x8xbf16> to vector<8x8x8xbf16>
    %43 = vector.shape_cast %42 : vector<8x8x8xbf16> to vector<64x8xbf16>
    %c0_29 = arith.constant 0 : index
    %c0_30 = arith.constant 0 : index
    %c0_31 = arith.constant 0 : index
    %44 = vector.load %arg11[%c0_29, %c0_30, %c0_31] : memref<1x8x32xbf16, #tpu.memory_space<vmem>>, vector<1x8x32xbf16>
    %45 = vector.shape_cast %44 : vector<1x8x32xbf16> to vector<8x32xbf16>
    %cst = arith.constant dense<0.000000e+00> : vector<64x32xf32>
    %46 = tpu.matmul %43, %45, %cst {dimension_numbers = #tpu.dot_dimension_numbers<[1], [0], [0], [1], [0, 0, 1, 1], [], []>} : vector<64x8xbf16>, vector<8x32xbf16>, vector<64x32xf32> -> vector<64x32xf32>
    %47 = vector.shape_cast %46 : vector<64x32xf32> to vector<8x8x32xf32>
    %48 = vector.shape_cast %31 : vector<8x32xf32> to vector<8x1x32xf32>
    %49 = vector.broadcast %48 : vector<8x1x32xf32> to vector<8x8x32xf32>
    %50 = arith.addf %47, %49 : vector<8x8x32xf32>
    %51 = vector.shape_cast %34 : vector<8x32xf32> to vector<1x8x32xf32>
    %52 = vector.broadcast %51 : vector<1x8x32xf32> to vector<8x8x32xf32>
    %53 = arith.addf %50, %52 : vector<8x8x32xf32>
    %54 = vector.shape_cast %38 : vector<1x32xf32> to vector<1x1x32xf32>
    %55 = vector.broadcast %54 : vector<1x1x32xf32> to vector<8x8x32xf32>
    %56 = arith.addf %53, %55 : vector<8x8x32xf32>
    %57 = vector.shape_cast %23 : vector<8x3xf32> to vector<8x1x3xf32>
    %58 = vector.shape_cast %23 : vector<8x3xf32> to vector<8x1x3xf32>
    %59 = arith.mulf %57, %58 : vector<8x1x3xf32>
    %cst_32 = arith.constant dense<0.000000e+00> : vector<8x1xf32>
    %60 = vector.multi_reduction <add>, %59, %cst_32 [2] : vector<8x1x3xf32> to vector<8x1xf32>
    %61 = vector.shape_cast %60 : vector<8x1xf32> to vector<8x1x1xf32>
    %62 = vector.shape_cast %27 : vector<8x3xf32> to vector<1x8x3xf32>
    %63 = vector.shape_cast %27 : vector<8x3xf32> to vector<1x8x3xf32>
    %64 = arith.mulf %62, %63 : vector<1x8x3xf32>
    %cst_33 = arith.constant dense<0.000000e+00> : vector<1x8xf32>
    %65 = vector.multi_reduction <add>, %64, %cst_33 [2] : vector<1x8x3xf32> to vector<1x8xf32>
    %66 = vector.shape_cast %65 : vector<1x8xf32> to vector<1x8x1xf32>
    %67 = vector.shape_cast %23 : vector<8x3xf32> to vector<8x1x3xf32>
    %68 = vector.shape_cast %27 : vector<8x3xf32> to vector<1x8x3xf32>
    %69 = vector.broadcast %67 : vector<8x1x3xf32> to vector<8x8x3xf32>
    %70 = vector.broadcast %68 : vector<1x8x3xf32> to vector<8x8x3xf32>
    %71 = arith.mulf %69, %70 : vector<8x8x3xf32>
    %cst_34 = arith.constant dense<0.000000e+00> : vector<8x8xf32>
    %72 = vector.multi_reduction <add>, %71, %cst_34 [2] : vector<8x8x3xf32> to vector<8x8xf32>
    %73 = vector.shape_cast %72 : vector<8x8xf32> to vector<8x8x1xf32>
    %74 = arith.index_cast %arg1 : i32 to index
    %c0_35 = arith.constant 0 : index
    %75 = memref.load %arg9[%74, %c0_35] : memref<3x9xf32, #tpu.memory_space<smem>>
    %76 = arith.index_cast %arg1 : i32 to index
    %c3 = arith.constant 3 : index
    %77 = memref.load %arg9[%76, %c3] : memref<3x9xf32, #tpu.memory_space<smem>>
    %78 = arith.mulf %75, %75 : f32
    %79 = vector.broadcast %78 : f32 to vector<8x1x1xf32>
    %80 = arith.mulf %79, %61 : vector<8x1x1xf32>
    %cst_36 = arith.constant 2.000000e+00 : f32
    %81 = arith.mulf %cst_36, %75 : f32
    %82 = arith.mulf %81, %77 : f32
    %83 = vector.broadcast %82 : f32 to vector<8x8x1xf32>
    %84 = arith.mulf %83, %73 : vector<8x8x1xf32>
    %85 = vector.broadcast %80 : vector<8x1x1xf32> to vector<8x8x1xf32>
    %86 = arith.addf %85, %84 : vector<8x8x1xf32>
    %87 = arith.mulf %77, %77 : f32
    %88 = vector.broadcast %87 : f32 to vector<1x8x1xf32>
    %89 = arith.mulf %88, %66 : vector<1x8x1xf32>
    %90 = vector.broadcast %89 : vector<1x8x1xf32> to vector<8x8x1xf32>
    %91 = arith.addf %86, %90 : vector<8x8x1xf32>
    %cst_37 = arith.constant 9.99999993E-9 : f32
    %92 = vector.broadcast %cst_37 : f32 to vector<8x8x1xf32>
    %93 = arith.maximumf %91, %92 : vector<8x8x1xf32>
    %94 = math.sqrt %93 : vector<8x8x1xf32>
    %95 = vector.extract_strided_slice %40 {offsets = [0, 0], sizes = [1, 32], strides = [1, 1]} : vector<3x32xf32> to vector<1x32xf32>
    %96 = vector.shape_cast %95 : vector<1x32xf32> to vector<1x1x32xf32>
    %97 = vector.broadcast %94 : vector<8x8x1xf32> to vector<8x8x32xf32>
    %98 = vector.broadcast %96 : vector<1x1x32xf32> to vector<8x8x32xf32>
    %99 = arith.mulf %97, %98 : vector<8x8x32xf32>
    %100 = arith.addf %56, %99 : vector<8x8x32xf32>
    %101 = arith.index_cast %arg1 : i32 to index
    %c1 = arith.constant 1 : index
    %102 = memref.load %arg9[%101, %c1] : memref<3x9xf32, #tpu.memory_space<smem>>
    %103 = arith.index_cast %arg1 : i32 to index
    %c4 = arith.constant 4 : index
    %104 = memref.load %arg9[%103, %c4] : memref<3x9xf32, #tpu.memory_space<smem>>
    %105 = arith.mulf %102, %102 : f32
    %106 = vector.broadcast %105 : f32 to vector<8x1x1xf32>
    %107 = arith.mulf %106, %61 : vector<8x1x1xf32>
    %cst_38 = arith.constant 2.000000e+00 : f32
    %108 = arith.mulf %cst_38, %102 : f32
    %109 = arith.mulf %108, %104 : f32
    %110 = vector.broadcast %109 : f32 to vector<8x8x1xf32>
    %111 = arith.mulf %110, %73 : vector<8x8x1xf32>
    %112 = vector.broadcast %107 : vector<8x1x1xf32> to vector<8x8x1xf32>
    %113 = arith.addf %112, %111 : vector<8x8x1xf32>
    %114 = arith.mulf %104, %104 : f32
    %115 = vector.broadcast %114 : f32 to vector<1x8x1xf32>
    %116 = arith.mulf %115, %66 : vector<1x8x1xf32>
    %117 = vector.broadcast %116 : vector<1x8x1xf32> to vector<8x8x1xf32>
    %118 = arith.addf %113, %117 : vector<8x8x1xf32>
    %cst_39 = arith.constant 9.99999993E-9 : f32
    %119 = vector.broadcast %cst_39 : f32 to vector<8x8x1xf32>
    %120 = arith.maximumf %118, %119 : vector<8x8x1xf32>
    %121 = math.sqrt %120 : vector<8x8x1xf32>
    %122 = vector.extract_strided_slice %40 {offsets = [1, 0], sizes = [1, 32], strides = [1, 1]} : vector<3x32xf32> to vector<1x32xf32>
    %123 = vector.shape_cast %122 : vector<1x32xf32> to vector<1x1x32xf32>
    %124 = vector.broadcast %121 : vector<8x8x1xf32> to vector<8x8x32xf32>
    %125 = vector.broadcast %123 : vector<1x1x32xf32> to vector<8x8x32xf32>
    %126 = arith.mulf %124, %125 : vector<8x8x32xf32>
    %127 = arith.addf %100, %126 : vector<8x8x32xf32>
    %128 = arith.index_cast %arg1 : i32 to index
    %c2 = arith.constant 2 : index
    %129 = memref.load %arg9[%128, %c2] : memref<3x9xf32, #tpu.memory_space<smem>>
    %130 = arith.index_cast %arg1 : i32 to index
    %c5 = arith.constant 5 : index
    %131 = memref.load %arg9[%130, %c5] : memref<3x9xf32, #tpu.memory_space<smem>>
    %132 = arith.mulf %129, %129 : f32
    %133 = vector.broadcast %132 : f32 to vector<8x1x1xf32>
    %134 = arith.mulf %133, %61 : vector<8x1x1xf32>
    %cst_40 = arith.constant 2.000000e+00 : f32
    %135 = arith.mulf %cst_40, %129 : f32
    %136 = arith.mulf %135, %131 : f32
    %137 = vector.broadcast %136 : f32 to vector<8x8x1xf32>
    %138 = arith.mulf %137, %73 : vector<8x8x1xf32>
    %139 = vector.broadcast %134 : vector<8x1x1xf32> to vector<8x8x1xf32>
    %140 = arith.addf %139, %138 : vector<8x8x1xf32>
    %141 = arith.mulf %131, %131 : f32
    %142 = vector.broadcast %141 : f32 to vector<1x8x1xf32>
    %143 = arith.mulf %142, %66 : vector<1x8x1xf32>
    %144 = vector.broadcast %143 : vector<1x8x1xf32> to vector<8x8x1xf32>
    %145 = arith.addf %140, %144 : vector<8x8x1xf32>
    %cst_41 = arith.constant 9.99999993E-9 : f32
    %146 = vector.broadcast %cst_41 : f32 to vector<8x8x1xf32>
    %147 = arith.maximumf %145, %146 : vector<8x8x1xf32>
    %148 = math.sqrt %147 : vector<8x8x1xf32>
    %149 = vector.extract_strided_slice %40 {offsets = [2, 0], sizes = [1, 32], strides = [1, 1]} : vector<3x32xf32> to vector<1x32xf32>
    %150 = vector.shape_cast %149 : vector<1x32xf32> to vector<1x1x32xf32>
    %151 = vector.broadcast %148 : vector<8x8x1xf32> to vector<8x8x32xf32>
    %152 = vector.broadcast %150 : vector<1x1x32xf32> to vector<8x8x32xf32>
    %153 = arith.mulf %151, %152 : vector<8x8x32xf32>
    %154 = arith.addf %127, %153 : vector<8x8x32xf32>
    %155 = arith.index_cast %arg1 : i32 to index
    %c8 = arith.constant 8 : index
    %156 = memref.load %arg9[%155, %c8] : memref<3x9xf32, #tpu.memory_space<smem>>
    %157 = arith.negf %154 : vector<8x8x32xf32>
    %158 = math.exp %157 : vector<8x8x32xf32>
    %cst_42 = arith.constant 1.000000e+00 : f32
    %159 = vector.broadcast %cst_42 : f32 to vector<8x8x32xf32>
    %160 = arith.addf %159, %158 : vector<8x8x32xf32>
    %161 = arith.divf %159, %160 : vector<8x8x32xf32>
    %162 = vector.shape_cast %37 : vector<1x32xf32> to vector<1x1x32xf32>
    %163 = vector.broadcast %162 : vector<1x1x32xf32> to vector<8x8x32xf32>
    %164 = arith.mulf %161, %163 : vector<8x8x32xf32>
    %cst_43 = arith.constant dense<0.000000e+00> : vector<8x8xf32>
    %165 = vector.multi_reduction <add>, %164, %cst_43 [2] : vector<8x8x32xf32> to vector<8x8xf32>
    %166 = vector.shape_cast %165 : vector<8x8xf32> to vector<8x8x1xf32>
    %167 = vector.broadcast %156 : f32 to vector<8x8x1xf32>
    %168 = arith.addf %166, %167 : vector<8x8x1xf32>
    %169 = arith.negf %168 : vector<8x8x1xf32>
    %170 = math.exp %169 : vector<8x8x1xf32>
    %cst_44 = arith.constant 1.000000e+00 : f32
    %171 = vector.broadcast %cst_44 : f32 to vector<8x8x1xf32>
    %172 = arith.addf %171, %170 : vector<8x8x1xf32>
    %173 = arith.divf %171, %172 : vector<8x8x1xf32>
    %cst_45 = arith.constant 0.000000e+00 : f32
    %174 = vector.broadcast %cst_45 : f32 to vector<8x8x32xf32>
    %175 = arith.maximumf %154, %174 : vector<8x8x32xf32>
    %c0_46 = arith.constant 0 : index
    %c0_47 = arith.constant 0 : index
    %c0_48 = arith.constant 0 : index
    %176 = vector.load %arg6[%c0_46, %c0_47, %c0_48] : memref<1x8x1xf32, #tpu.memory_space<vmem>>, vector<1x8x1xf32>
    %177 = vector.shape_cast %176 : vector<1x8x1xf32> to vector<8x1xf32>
    %178 = vector.shape_cast %177 : vector<8x1xf32> to vector<1x8x1xf32>
    %179 = vector.broadcast %178 : vector<1x8x1xf32> to vector<8x8x32xf32>
    %180 = arith.mulf %175, %179 : vector<8x8x32xf32>
    %cst_49 = arith.constant dense<0.000000e+00> : vector<8x32xf32>
    %181 = vector.multi_reduction <add>, %180, %cst_49 [1] : vector<8x8x32xf32> to vector<8x32xf32>
    %182 = vector.broadcast %178 : vector<1x8x1xf32> to vector<8x8x1xf32>
    %183 = arith.mulf %173, %182 : vector<8x8x1xf32>
    %cst_50 = arith.constant dense<0.000000e+00> : vector<8x1xf32>
    %184 = vector.multi_reduction <add>, %183, %cst_50 [1] : vector<8x8x1xf32> to vector<8x1xf32>
    %185 = vector.shape_cast %27 : vector<8x3xf32> to vector<1x8x3xf32>
    %186 = vector.broadcast %183 : vector<8x8x1xf32> to vector<8x8x3xf32>
    %187 = vector.broadcast %185 : vector<1x8x3xf32> to vector<8x8x3xf32>
    %188 = arith.mulf %186, %187 : vector<8x8x3xf32>
    %cst_51 = arith.constant dense<0.000000e+00> : vector<8x3xf32>
    %189 = vector.multi_reduction <add>, %188, %cst_51 [1] : vector<8x8x3xf32> to vector<8x3xf32>
    %190 = arith.index_cast %arg1 : i32 to index
    %c6 = arith.constant 6 : index
    %191 = memref.load %arg9[%190, %c6] : memref<3x9xf32, #tpu.memory_space<smem>>
    %192 = arith.index_cast %arg1 : i32 to index
    %c7 = arith.constant 7 : index
    %193 = memref.load %arg9[%192, %c7] : memref<3x9xf32, #tpu.memory_space<smem>>
    %c0_52 = arith.constant 0 : index
    %c0_53 = arith.constant 0 : index
    %c0_54 = arith.constant 0 : index
    %194 = vector.load %arg7[%c0_52, %c0_53, %c0_54] : memref<1x8x1xf32, #tpu.memory_space<vmem>>, vector<1x8x1xf32>
    %195 = vector.shape_cast %194 : vector<1x8x1xf32> to vector<8x1xf32>
    %196 = arith.index_cast %arg0 : i32 to index
    %197 = memref.load %arg8[%196] : memref<2xf32, #tpu.memory_space<smem>>
    %198 = vector.broadcast %197 : f32 to vector<8x1xf32>
    %199 = arith.mulf %195, %198 : vector<8x1xf32>
    %200 = vector.broadcast %199 : vector<8x1xf32> to vector<8x32xf32>
    %201 = arith.mulf %181, %200 : vector<8x32xf32>
    %202 = vector.broadcast %191 : f32 to vector<8x3xf32>
    %203 = arith.mulf %202, %23 : vector<8x3xf32>
    %204 = vector.broadcast %184 : vector<8x1xf32> to vector<8x3xf32>
    %205 = arith.mulf %203, %204 : vector<8x3xf32>
    %206 = vector.broadcast %193 : f32 to vector<8x3xf32>
    %207 = arith.mulf %206, %189 : vector<8x3xf32>
    %208 = arith.addf %205, %207 : vector<8x3xf32>
    %209 = vector.broadcast %199 : vector<8x1xf32> to vector<8x3xf32>
    %210 = arith.mulf %208, %209 : vector<8x3xf32>
    %c1_i32_55 = arith.constant 1 : i32
    %211 = arith.muli %10, %c1_i32_55 : i32
    %212 = arith.addi %211, %arg2 : i32
    %213 = arith.index_cast %212 : i32 to index
    %c0_56 = arith.constant 0 : index
    %c0_57 = arith.constant 0 : index
    %214 = vector.load %arg16[%213, %c0_56, %c0_57] : memref<2x8x32xf32, #tpu.memory_space<vmem>>, vector<1x8x32xf32>
    %215 = vector.shape_cast %214 : vector<1x8x32xf32> to vector<8x32xf32>
    %216 = vector.shape_cast %201 : vector<8x32xf32> to vector<1x8x32xf32>
    tpu.vector_store %arg16[%213, %c0_56, %c0_57], %216 {strides = array<i32>} : memref<2x8x32xf32, #tpu.memory_space<vmem>>, vector<1x8x32xf32>,
    %c1_i32_58 = arith.constant 1 : i32
    %217 = arith.muli %10, %c1_i32_58 : i32
    %218 = arith.addi %217, %arg2 : i32
    %219 = arith.index_cast %218 : i32 to index
    %c0_59 = arith.constant 0 : index
    %c0_60 = arith.constant 0 : index
    %220 = vector.load %arg17[%219, %c0_59, %c0_60] : memref<2x8x3xf32, #tpu.memory_space<vmem>>, vector<1x8x3xf32>
    %221 = vector.shape_cast %220 : vector<1x8x3xf32> to vector<8x3xf32>
    %222 = vector.shape_cast %210 : vector<8x3xf32> to vector<1x8x3xf32>
    tpu.vector_store %arg17[%219, %c0_59, %c0_60], %222 {strides = array<i32>} : memref<2x8x3xf32, #tpu.memory_space<vmem>>, vector<1x8x3xf32>,
    %c0_61 = arith.constant 0 : index
    %c0_62 = arith.constant 0 : index
    %c0_63 = arith.constant 0 : index
    %223 = vector.load %arg14[%c0_61, %c0_62, %c0_63] : memref<1x8x32xf32, #tpu.memory_space<vmem>>, vector<1x8x32xf32>
    %224 = vector.shape_cast %223 : vector<1x8x32xf32> to vector<8x32xf32>
    %225 = vector.shape_cast %201 : vector<8x32xf32> to vector<1x8x32xf32>
    tpu.vector_store %arg14[%c0_61, %c0_62, %c0_63], %225 {strides = array<i32>} : memref<1x8x32xf32, #tpu.memory_space<vmem>>, vector<1x8x32xf32>,
    %c0_64 = arith.constant 0 : index
    %c0_65 = arith.constant 0 : index
    %c0_66 = arith.constant 0 : index
    %226 = vector.load %arg15[%c0_64, %c0_65, %c0_66] : memref<1x8x3xf32, #tpu.memory_space<vmem>>, vector<1x8x3xf32>
    %227 = vector.shape_cast %226 : vector<1x8x3xf32> to vector<8x3xf32>
    %228 = vector.shape_cast %210 : vector<8x3xf32> to vector<1x8x3xf32>
    tpu.vector_store %arg15[%c0_64, %c0_65, %c0_66], %228 {strides = array<i32>} : memref<1x8x3xf32, #tpu.memory_space<vmem>>, vector<1x8x3xf32>,
    return
  }
  func.func @transform_0(%arg0: i32, %arg1: i32, %arg2: i32) -> (i32, i32, i32) {
    %c0_i32 = arith.constant 0 : i32
    %c0_i32_0 = arith.constant 0 : i32
    %c0_i32_1 = arith.constant 0 : i32
    return %arg0, %c0_i32, %c0_i32_0 : i32, i32, i32
  }
  func.func @transform_1(%arg0: i32, %arg1: i32, %arg2: i32) -> (i32, i32, i32) {
    %c0_i32 = arith.constant 0 : i32
    %c0_i32_0 = arith.constant 0 : i32
    %c0_i32_1 = arith.constant 0 : i32
    return %arg0, %c0_i32, %c0_i32_0 : i32, i32, i32
  }
  func.func @transform_2(%arg0: i32, %arg1: i32, %arg2: i32) -> (i32, i32, i32, i32) {
    %c0_i32 = arith.constant 0 : i32
    %c0_i32_0 = arith.constant 0 : i32
    %c0_i32_1 = arith.constant 0 : i32
    return %arg0, %arg2, %c0_i32, %c0_i32_0 : i32, i32, i32, i32
  }
  func.func @transform_3(%arg0: i32, %arg1: i32, %arg2: i32) -> (i32, i32, i32) {
    %c0_i32 = arith.constant 0 : i32
    %c0_i32_0 = arith.constant 0 : i32
    %c0_i32_1 = arith.constant 0 : i32
    return %arg0, %c0_i32, %c0_i32_0 : i32, i32, i32
  }
  func.func @transform_4(%arg0: i32, %arg1: i32, %arg2: i32) -> (i32, i32, i32) {
    %c0_i32 = arith.constant 0 : i32
    %c0_i32_0 = arith.constant 0 : i32
    return %arg0, %arg2, %c0_i32 : i32, i32, i32
  }
  func.func @transform_5(%arg0: i32, %arg1: i32, %arg2: i32) -> i32 {
    %c0_i32 = arith.constant 0 : i32
    %c0_i32_0 = arith.constant 0 : i32
    return %c0_i32 : i32
  }
  func.func @transform_6(%arg0: i32, %arg1: i32, %arg2: i32) -> (i32, i32) {
    %c0_i32 = arith.constant 0 : i32
    %c0_i32_0 = arith.constant 0 : i32
    %c0_i32_1 = arith.constant 0 : i32
    return %c0_i32, %c0_i32_0 : i32, i32
  }
  func.func @transform_7(%arg0: i32, %arg1: i32, %arg2: i32) -> (i32, i32, i32) {
    %c0_i32 = arith.constant 0 : i32
    %c0_i32_0 = arith.constant 0 : i32
    %c0_i32_1 = arith.constant 0 : i32
    return %arg1, %c0_i32, %c0_i32_0 : i32, i32, i32
  }
  func.func @transform_8(%arg0: i32, %arg1: i32, %arg2: i32) -> (i32, i32, i32) {
    %c0_i32 = arith.constant 0 : i32
    %c0_i32_0 = arith.constant 0 : i32
    %c0_i32_1 = arith.constant 0 : i32
    return %arg1, %c0_i32, %c0_i32_0 : i32, i32, i32
  }
  func.func @transform_9(%arg0: i32, %arg1: i32, %arg2: i32) -> (i32, i32, i32) {
    %c0_i32 = arith.constant 0 : i32
    %c0_i32_0 = arith.constant 0 : i32
    %c0_i32_1 = arith.constant 0 : i32
    return %arg1, %c0_i32, %c0_i32_0 : i32, i32, i32
  }
  func.func @transform_10(%arg0: i32, %arg1: i32, %arg2: i32) -> (i32, i32, i32) {
    %c0_i32 = arith.constant 0 : i32
    %c0_i32_0 = arith.constant 0 : i32
    %c0_i32_1 = arith.constant 0 : i32
    return %arg1, %c0_i32, %c0_i32_0 : i32, i32, i32
  }
  func.func @transform_11(%arg0: i32, %arg1: i32, %arg2: i32) -> (i32, i32, i32) {
    %c0_i32 = arith.constant 0 : i32
    %c0_i32_0 = arith.constant 0 : i32
    return %arg0, %arg2, %c0_i32 : i32, i32, i32
  }
  func.func @transform_12(%arg0: i32, %arg1: i32, %arg2: i32) -> (i32, i32, i32) {
    %c0_i32 = arith.constant 0 : i32
    %c0_i32_0 = arith.constant 0 : i32
    return %arg0, %arg2, %c0_i32 : i32, i32, i32
  }
}

</mosaic_0001>

<bundles_post_ra>
// kernel: _lambda_.1
= control target key start
LH: loop header
LB: loop body
LE: loop exit
PB: predicated region body
PF: predicated region fallthrough
CT: control target
= control target key end

     0   :  { %s4136_s0 = inlined_call_operand.vmem [shape: f32[2,8,3], index: 0, kind: input, shape index: {}]   ;;  %s4137_s1 = inlined_call_operand.vmem [shape: f32[2,8,32], index: 1, kind: input, shape index: {}]   ;;  %s4138_s2 = inlined_call_operand.vmem [shape: bf16[2,8,8,8], index: 2, kind: input, shape index: {}]   ;;  %s4139_s3 = inlined_call_operand.vmem [shape: f32[2,8,1], index: 3, kind: input, shape index: {}, may-alias: {3,4}]   ;;  %s4140_s4 = inlined_call_operand.vmem [shape: f32[2,8,1], index: 4, kind: input, shape index: {}, may-alias: {3,4}]   ;;  %s4141_s5 = inlined_call_operand.vmem [shape: f32[2], index: 5, kind: input, shape index: {}]   ;;  %s4142_s6 = inlined_call_operand.vmem [shape: f32[3,9], index: 6, kind: input, shape index: {}]   ;;  %s4143_s7 = inlined_call_operand.vmem [shape: f32[3,32,64], index: 7, kind: input, shape index: {}]   ;;  %s4144_s8 = inlined_call_operand.vmem [shape: bf16[3,8,32], index: 8, kind: input, shape index: {}]   ;;  %s4145_s9 = inlined_call_operand.vmem [shape: f32[3,3,32], index: 9, kind: input, shape index: {}]   ;;  %s4146_s10 = inlined_call_operand.vmem [shape: f32[3,2,32], index: 10, kind: input, shape index: {}]   ;;  %s4147_s11 = inlined_call_operand.hbm [shape: f32[2,8,32], index: 11, kind: output, shape index: {0}]   ;;  %s4148_s12 = inlined_call_operand.vmem [shape: f32[2,8,3], index: 12, kind: output, shape index: {1}]  }
   0x1   :  { %4172 = sst [smem:[#allocation31_spill]] %s4136_s0 }
   0x2   :  { %4173 = sst [smem:[#allocation32_spill]] %s4137_s1 }
   0x3   :  { %4174 = sst [smem:[#allocation33_spill]] %s4138_s2 }
   0x4   :  { %4175 = sst [smem:[#allocation34_spill]] %s4141_s5 }
   0x5   :  { %4176 = sst [smem:[#allocation35_spill]] %s4142_s6 }
   0x6   :  { %4177 = sst [smem:[#allocation36_spill]] %s4143_s7 }
   0x7   :  { %4178 = sst [smem:[#allocation37_spill]] %s4147_s11 }
   0x8   :  { %18 = vsyncpa [#allocation7], 0 }
   0x9   :  { %19 = vsyncpa [#allocation9], 0 }
   0xa   :  { %20 = vsyncpa [#allocation6], 0 }
   0xb   :  { %22 = vsyncpa [#allocation6 + $0x1], 0  ;;  %s2985_s21 = smov 0   ;;  %s2987_s22 = smov 0  }
   0xc   :  { %s2989_s23 = smov 0   ;;  %s2991_s24 = smov 0  }
   0xd   :  { %s2993_s25 = smov 0   ;;  %s2995_s26 = smov 0  }
   0xe   :  { %s2997_s27 = smov 0   ;;  %s2999_s28 = smov 0  }
   0xf LB: > { %4179 = sst [smem:[#allocation14_spill]] %s2881_s21  ;;  %s2457_s29 = sadd.s32 4294967295, %s2909_s28   ;;  %s2909_s28 = sphi %s2999_s28, %s28_s28   ;;  %s2905_s27 = sphi %s2997_s27, %s4296_s27   ;;  %s2901_s26 = sphi %s2995_s26, %s4295_s26   ;;  %s2897_s25 = sphi %s2993_s25, %s4294_s25   ;;  %s2893_s24 = sphi %s2991_s24, %s4293_s24   ;;  %s2889_s23 = sphi %s2989_s23, %s4292_s23   ;;  %s2885_s22 = sphi %s2987_s22, %s4291_s22   ;;  %s2881_s21 = sphi %s2985_s21, %s4290_s21  }
  0x10   : > { %4180 = sst [smem:[#allocation15_spill]] %s2885_s22  ;;  %s2458_s30 = sadd.s32 4294967294, %s2909_s28  }
  0x11   : > { %4181 = sst [smem:[#allocation16_spill]] %s2889_s23  ;;  %s43_s13 = sadd.s32 1, %s2901_s26 }
  0x12   : > { %4182 = sst [smem:[#allocation17_spill]] %s2901_s26  ;;  %s47_s14 = sadd.s32 1, %s2905_s27 }
  0x13   : > { %4183 = sst [smem:[#allocation18_spill]] %s2905_s27  ;;  %p45_p0 = scmp.ge.s32.totalorder %s43_s13, 3 }
  0x14   : > { %4184 = sst [smem:[#allocation19_spill]] %s2909_s28  ;;  %s336_s15 = sadd.s32 1, %s2889_s23 }
  0x15   : > { %p346_p1 = scmp.ne.s32.totalorder %s2889_s23, %s2885_s22  ;;  %p347_p2 = scmp.eq.s32.totalorder %s2457_s29, 5 }
  0x16   : > { %s4298_s13 = smov (%p45_p0, %s43_s13), 0  ;;  %s4300_s14 = smov (!%p45_p0, %s47_s14), %s2905_s27 }
  0x17   : > { %4185 = sst [smem:[#allocation20_spill]] %s4298_s13  ;;  %p3035_p3 = por %p347_p2, %p346_p1 }
  0x18   : > { %p352_p4 = scmp.ne.s32.totalorder %s2885_s22, %s2881_s21  ;;  %p49_p5 = scmp.ge.s32.totalorder %s4300_s14, 2 }
  0x19   : > { %s4186_s16 = scalar_select %p3035_p3, 1, 0 }
  0x1a   : > { %p353_p6 = scmp.eq.s32.totalorder %s2458_s30, 5  ;;  %p2459_p7 = scmp.ge.s32.totalorder %s2909_s28, 1 }
  0x1b   : > { %4187 = sst [smem:[#allocation21_spill]] %s4186_s16  ;;  %p388_p8 = scmp.lt.s32.totalorder %s2909_s28, 7 }
  0x1c   : > { %s4302_s14 = smov (%p49_p5, %s4300_s14), 0  ;;  %p3045_p9 = por %p353_p6, %p352_p4 }
  0x1d   : > { %4188 = sst [smem:[#allocation22_spill]] %s4302_s14  ;;  %p3049_p10 = pnand %p2459_p7, %p388_p8 }
  0x1e   : > { %s4189_s17 = scalar_select %p3045_p9, 1, 0 }
  0x1f   : > { %s4191_s18 = scalar_select %p3049_p10, 1, 0 }
  0x20   : > { %4190 = sst [smem:[#allocation23_spill]] %s4189_s17  ;;  %s331_s19 = ssub.s32 %s2905_s27, %s4302_s14 }
  0x21   : > { %p334_p11 = scmp.eq.s32.totalorder %s331_s19, 0  ;;  %p2568_p12 = pneg %p3049_p10 }
  0x22   : > { %p3057_p13 = scmp.eq.s32.totalorder %s2457_s29, 0  ;;  %s4193_s5 = sld [smem:[#allocation34_spill]] }
  0x23   : > { %s3065_s21 = scalar_select %p334_p11, %s2889_s23, %s336_s15  }
  0x24   : > { %s4192_s20 = scalar_select %p3057_p13, 1, 0 }
  0x25   : > { %4194 = sst [smem:[#allocation24_spill]] %s3065_s21  ;;  %p3069_p0 = pnand %p3057_p13, %p2568_p12 }
  0x26   : > { %s4196_s6 = sld [smem:[#allocation35_spill]] }
  0x27   : > { %p2779_p2 = pneg %p3069_p0 }
  0x28   : > { %s401_s26 = sshll.u32 %s4193_s5, 4  ;;  %s402_s26 = int_to_ptr.vmem [resolvable:$true] %s401_s26 }
  0x29   : > { %s2777_s27 = scalar_lea.vmem %s402_s26, 16  ;;  %p2785_p6 = scmp.lt.s32.totalorder %s402_s26, %s402_s26 }
  0x2a   : > { %p2778_p1 = scmp.ne.s32.totalorder %s402_s26, %s2777_s27  ;;  %p2786_p7 = scmp.lt.s32.totalorder %s2777_s27, %s2777_s27 }
  0x2c   : > { %s412_s29 = sshll.u32 %s4196_s6, 4  ;;  %p2780_p4 = pnand %p2779_p2, %p2778_p1  ;;  %s413_s29 = int_to_ptr.vmem [resolvable:$true] %s412_s29 }
  0x2d   : > { %p2787_p8 = por %p2786_p7, %p2785_p6 }
  0x2e   : > { %p2781_p5 = pneg %p2780_p4 }
  0x30   : > { %p2788_p11 = pnand %p2787_p8, %p2781_p5 }
  0x32   : > { %2791 = shalt.err (!%p2788_p11)
}
  0x33   : > { %s2911_s13 = smov [#allocation5]   ;;  %s2792_s15 = scalar_lea.vmem %s413_s29, 64 }
  0x34   : > { %2571 = dma.vmem_to_smem (!%p3069_p0), %s402_s26, 16, %s2911_s13, [#allocation7]  }
  0x35   : > { %p2793_p12 = scmp.ne.s32.totalorder %s413_s29, %s2792_s15  ;;  %p2800_p13 = scmp.lt.s32.totalorder %s413_s29, %s413_s29 }
  0x36   : > { %p2801_p10 = scmp.lt.s32.totalorder %s2792_s15, %s2792_s15 }
  0x37   : > { %p2795_p9 = pnand %p2793_p12, %p2779_p2 }
  0x38   : > { %p2802_p1 = por %p2801_p10, %p2800_p13 }
  0x39   : > { %p2796_p3 = pneg %p2795_p9 }
  0x3b   : > { %p2803_p4 = pnand %p2802_p1, %p2796_p3 }
  0x3d   : > { %2806 = shalt.err (!%p2803_p4)
}
  0x3e   : > { %s2912_s14 = smov [#allocation8]   ;;  %p4197_p5 = scmp.ne.s32.totalorder %s4191_s18, 0 }
  0x3f   : > { %2574 = dma.vmem_to_smem (!%p3069_p0), %s413_s29, 64, %s2912_s14, [#allocation9]  }
  0x40   : > { %498 = sbr.rel (%p4197_p5) target bundleno = 835 (0x343), region = 64 }
  0x47   : > { %p4198_p6 = scmp.ne.s32.totalorder %s4192_s20, 0 }
  0x49   : > { %2868 = dma.done.wait (%p4198_p6), [#allocation7], 16  }
  0x4a   : > { %2870 = vsyncadd (%p4198_p6), [#allocation7], 4294967280 }
  0x4b   : > { %2872 = dma.done.wait (%p4198_p6), [#allocation9], 64  }
  0x4c   : > { %2874 = vsyncadd (%p4198_p6), [#allocation9], 4294967232 }
  0x4d   : > { %508 = sfence }
  0x4e   : > { %s4158_s26 = sand.u32 1, %s2885_s22   ;;  %p592_p3 = scmp.lt.s32.totalorder %s2897_s25, 1 }
  0x4f   : > { %s3096_s27 = sshll.u32 %s4158_s26, 3  ;;  %p621_p9 = scmp.lt.s32.totalorder %s2893_s24, 2 }
  0x50   : > { %p646_p10 = scmp.lt.s32.totalorder %s2893_s24, 0  ;;  %s4199_s0 = sld [smem:[#allocation31_spill]] }
  0x51   : > { %s593_s17 = scalar_select %p592_p3, %s2897_s25, 1 }
  0x52   : > { %s622_s18 = scalar_select %p621_p9, %s2893_s24, 2 }
  0x53   : > { %s3102_s20 = sshll.u32 %s593_s17, 3  ;;  %s2517_s30 = sshll.u32 %s593_s17, 5 }
  0x54   : > { %s4200_s1 = sld [smem:[#allocation32_spill]]  ;;  %s4201_s2 = sld [smem:[#allocation33_spill]] }
  0x55   : > { %s2518_s29 = sshll.u32 %s622_s18, 5  ;;  %s4202_s7 = sld [smem:[#allocation36_spill]] }
  0x56   : > { %s595_s13 = scalar_lea.vmem %s4199_s0, %s3102_s20  ;;  %s2475_s14 = sshll.u32 %s622_s18, 2 }
  0x57   : > { %s3133_s6 = scalar_lea.vmem %s4144_s8, %s2475_s14  ;;  %s2477_s16 = sshll.u32 %s622_s18, 1 }
  0x58   : > { %p659_p13 = scmp.eq.s32.totalorder %s2893_s24, 0 }
  0x59   : > { %vm666_vm0 = vcmask (%p659_p13), 261120   ;;  %v668_v1 = vld [vmem:[%s595_s13] sm:$0xff] (%p659_p13)  ;;  %vm669_vm1 = vcmask (%p659_p13), 23552  }
  0x5a   : > { %s599_s26 = scalar_lea.vmem %s4200_s1, %s3102_s20  ;;  %s3115_s21 = scalar_lea.vmem %s4201_s2, %s2517_s30  ;;  %670 = vst.msk [vmem:[#allocation3] sm:$0xff] (%p659_p13), %vm669_vm1, %v668_v1 }
  0x5b   : > { %s3128_s15 = scalar_lea.vmem %s4202_s7, %s2518_s29  ;;  %s3138_s30 = scalar_lea.vmem %s4145_s9, %s2475_s14  ;;  %v665_v0 = vld [vmem:[%s599_s26] sm:$0xff] (%p659_p13) }
  0x5c   : > { %s3147_s29 = scalar_lea.vmem %s4146_s10, %s2477_s16  ;;  %s647_s2 = ssub.s32 0, %s2893_s24  ;;  %667 = vst.msk [vmem:[#allocation2] sm:$0xff] (%p659_p13), %vm666_vm0, %v665_v0 }
  0x5d   : > { %s2479_s1 = smin.u32 %s2893_s24, %s647_s2 }
  0x5e   : > { %s649_s5 = sand.u32 1, %s2479_s1   ;;  %664 = sbr.rel (!%p659_p13) target bundleno = 101 (0x65), region = 76 }
  0x5f   : > { %s650_s7 = ssub.s32 0, %s649_s5 }
  0x60   : > { %s4304_s7 = smov (!%p646_p10, %s650_s7), %s649_s5 }
  0x61   : > { %p2481_p0 = scmp.lt.s32.totalorder %s4304_s7, 0  ;;  %s656_s14 = sadd.s32 2, %s4304_s7 }
  0x63   : > { %s4306_s14 = smov (!%p2481_p0, %s656_s14), %s4304_s7 }
  0x64   : > { %s658_s18 = ssub.s32 1, %s4306_s14 }
  0x65 PF: > { %v677_v2 = vld [vmem:[%s3128_s15] sm:$0xff]  ;;  %v678_v3 = vld [vmem:[%s3128_s15 + $0x8] sm:$0xff]  ;;  %v679_v4 = vld [vmem:[%s3128_s15 + $0x10] sm:$0xff]  ;;  %v2913_v5 = vmov 0.0|0.0   ;;  %vm2914_vm2 = vmmov 0   ;;  %v2915_v8 = vmov 0.0   ;;  %v886_v15 = vlaneseq }
  0x66   : > { %2551 = vmatprep.subr.bf16.mxu0 %v2913_v5  ;;  %v2552_v6 = vpack.c.bf16 %v678_v3, %v677_v2  ;;  %v680_v7 = vld [vmem:[%s3128_s15 + $0x18] sm:$0xff]  ;;  %2538 = vmatprep.mubr.msk.f32.mxu0 %vm2914_vm2, %v2915_v8  ;;  %s2483_s2 = sshll.u32 %s4306_s14, 3  ;;  %v778_v9 = vld [vmem:[%s3133_s6] sm:$0xf]  ;;  %vm812_vm3 = vcmask 1043456   ;;  %vm799_vm4 = vcmask 64512  }
  0x67   : > { %2557 = vmatprep.subr.msk.bf16.mxu1 %vm812_vm3, %v778_v9  ;;  %v814_v10 = vsel %vm812_vm3, %v778_v9, 0  ;;  %v2659_v11 = vld [vmem:[%s3115_s21] sm:$0xff]   ;;  %v2555_v12 = vpack.c.bf16 %v680_v7, %v679_v4  ;;  %s3165_s7 = scalar_lea.vmem [#allocation3], %s2483_s2  ;;  %v2660_v14 = vld [vmem:[%s3115_s21 + $0x8] sm:$0xff]   ;;  %v2661_v17 = vld [vmem:[%s3115_s21 + $0x10] sm:$0xff]   ;;  %vm4167_vm5 = vcmask 23552  }
  0x68   : > { %2553 = vmatpush3.bf16.msra.mxu0 %v2552_v6  ;;  %v3168_v13 = vld [vmem:[%s3165_s7] sm:$0xff]  ;;  %2542 = vmatpush3.bf16.msra.mxu1 %v814_v10  ;;  %s675_s26 = scalar_lea.vmem [#allocation2], %s2483_s2  ;;  %vm4168_vm6 = vcmask 261120   ;;  %v2916_v20 = vmov 1966171168   ;;  %v3178_v22 = vshrl.u32 %v886_v15, 7 }
  0x69   : > { %2554 = vmatprep.subr.bf16.mxu0 %v2913_v5  ;;  %2543 = vmatprep.mubr.msk.bf16.mxu1 %vm799_vm4, %v2659_v11  ;;  %v1094_v16 = vmul.f32 %v3168_v13, %v3168_v13  ;;  %v676_v18 = vld [vmem:[%s675_s26] sm:$0xff]  ;;  %v884_v21 = vunpack.c.l.s4 %v2916_v20  ;;  %v1004_v23 = vcombine.high %v3168_v13, %v3168_v13  ;;  %v2662_v24 = vld [vmem:[%s3115_s21 + $0x18] sm:$0xff]   ;;  %vm1069_vm7 = vcmask 16384   ;;  %s2917_s21 = smov 96   ;;  %s3259_s13 = sshll.u32 %s2893_s24, 7 }
  0x6a   : > { %v3194_v32 = vsub.s32 0, %v3178_v22  ;;  %vm755_vm8 = vcmask 523264   ;;  %s1331_s15 = sadd.s32 1, %s3259_s13  ;;  %s1172_s6 = sld [smem:[#allocation8 + %s3259_s13]] }
  0x6b   : > { %2544 = vmatmul.mubr.msk.bf16.vlgmr.msra.gmra.mrb[0].mxu1 %vm799_vm4, %v2660_v14  ;;  %v1096_v19 = vsel %vm4167_vm5, %v1094_v16, 0.0  ;;  %v885_v25 = vunpack.c.0.s8 %v884_v21  ;;  %s1491_s23 = sadd.s32 2, %s3259_s13  ;;  %s1332_s28 = sld [smem:[#allocation8 + %s1331_s15]] }
  0x6c   : > { %2556 = vmatpush3.bf16.msra.mxu0 %v2555_v12  ;;  %2547 = vmatprep.mubr.msk.bf16.mxu1 %vm799_vm4, %v2661_v17  ;;  %4203 = vst [vmem:[#allocation25_spill] sm:$0xff] %v3194_v32  ;;  %s1173_s16 = sadd.s32 3, %s3259_s13  ;;  %s1492_s17 = sld [smem:[#allocation8 + %s1491_s23]] }
  0x6d   : > { %1097 = vadd.xlane.f32.xlu1 %v1096_v19  ;;  %v3185_v26 = vsub.s32 %v885_v25, %v3178_v22  ;;  %s1333_s0 = sadd.s32 4, %s3259_s13  ;;  %s3270_s24 = sld [smem:[#allocation8 + %s1173_s16]] }
  0x6e   : > { %s3272_s22 = sld [smem:[#allocation8 + %s1333_s0]]  ;;  %s1493_s1 = sadd.s32 5, %s3259_s13 }
  0x6f   : > { %2539 = vmatmul.mubr.msk.f32.vlgmr.msra.gmra.mrb[0].mxu0 %vm4168_vm6, %v676_v18  ;;  %v1011_v27 = vrot.slane %v3168_v13, %v3185_v26  ;;  %v1018_v28 = vrot.slane %v1004_v23, %v3185_v26 }
  0x70   : > { %s1175_s5 = smul.f32 %s1172_s6, %s1172_s6 }
  0x71   : > { %v1027_v29 = vrot.slane %v1011_v27, %v3185_v26  ;;  %v1034_v30 = vrot.slane %v1018_v28, %v3185_v26  ;;  %v1019_v31 = vcombine.high %v1011_v27, %v1011_v27  ;;  %v1020_v41 = vcombine.high %v1018_v28, %v1018_v28  ;;  %s1185_s2 = smul.f32 2.0, %s1172_s6 }
  0x72   : > { %s1335_s26 = smul.f32 %s1332_s28, %s1332_s28 }
  0x73   : > { %2548 = vmatmul.mubr.msk.bf16.gmra.mrb[4].mxu1 %vm799_vm4, %v2662_v24  ;;  %v1061_v33 = vmul.f32 %v1027_v29, %v1027_v29  ;;  %v1065_v34 = vmul.f32 %v1034_v30, %v1034_v30  ;;  %v1049_v35 = vcombine.high %v1027_v29, %v1027_v29  ;;  %v1041_v36 = vrot.slane %v1019_v31, %v3185_v26  ;;  %s1345_s15 = smul.f32 2.0, %s1332_s28 }
  0x74   : > { %v1102_v45 = vrot.slane %v1027_v29, %v3194_v32  ;;  %v1048_v52 = vrot.slane %v1020_v41, %v3185_v26  ;;  %v1050_v55 = vcombine.high %v1034_v30, %v1034_v30  ;;  %v1118_v0 = vrot.slane %v1034_v30, %v3194_v32  ;;  %s1495_s23 = smul.f32 %s1492_s17, %s1492_s17 }
  0x75   : > { %v1070_v37 = vsel %vm1069_vm7, %v1061_v33, 0.0  ;;  %v1063_v38 = vmul.f32 %v1049_v35, %v1049_v35  ;;  %v1051_v39 = vcombine.high %v1041_v36, %v1041_v36  ;;  %v1106_v40 = vrot.slane %v1041_v36, %v3194_v32  ;;  %s1186_s16 = smul.f32 %s1185_s2, %s3270_s24 }
  0x76   : > { %1071 = vadd.xlane.f32.xlu0 %v1070_v37  ;;  %v1082_v42 = vsel %vm1069_vm7, %v1065_v34, 0.0  ;;  %v1062_v44 = vmul.f32 %v1041_v36, %v1041_v36  ;;  %v1110_v48 = vrot.slane %v1049_v35, %v3194_v32  ;;  %v1139_v51 = vmul.f32 %v1102_v45, %v3168_v13  ;;  %s1505_s0 = smul.f32 2.0, %s1492_s17 }
  0x77   : > { %v1076_v43 = vsel %vm1069_vm7, %v1063_v38, 0.0  ;;  %v1064_v46 = vmul.f32 %v1051_v39, %v1051_v39  ;;  %v1140_v47 = vmul.f32 %v1106_v40, %v3168_v13  ;;  %v1066_v57 = vmul.f32 %v1048_v52, %v1048_v52  ;;  %s1346_s11 = smul.f32 %s1345_s15, %s3272_s22  ;;  %s4270_s15 = sld [smem:[#allocation21_spill]] }
  0x78   : > { %1077 = vadd.xlane.f32.xlu1 %v1076_v43  ;;  %v1073_v50 = vsel %vm1069_vm7, %v1062_v44, 0.0  ;;  %v1141_v54 = vmul.f32 %v1110_v48, %v3168_v13  ;;  %v1147_v56 = vsel %vm4167_vm5, %v1139_v51, 0.0  ;;  %v1114_v58 = vrot.slane %v1051_v39, %v3194_v32  ;;  %s1236_s19 = smul.f32 %s3270_s24, %s3270_s24  ;;  %s2919_s24 = smov [#allocation10]  }
  0x79   : > { %v1079_v49 = vsel %vm1069_vm7, %v1064_v46, 0.0  ;;  %v1150_v53 = vsel %vm4167_vm5, %v1140_v47, 0.0  ;;  %v1067_v60 = vmul.f32 %v1050_v55, %v1050_v55  ;;  %v1052_v61 = vcombine.high %v1048_v52, %v1048_v52  ;;  %s1396_s6 = smul.f32 %s3272_s22, %s3272_s22  ;;  %s2811_s22 = sshll.u32 %s2919_s24, 4  ;;  %s2812_s22 = int_to_ptr.vmem [resolvable:$false] %s2811_s22 }
  0x7a   : > { %1083 = vadd.xlane.f32.xlu0 %v1082_v42  ;;  %v1153_v59 = vsel %vm4167_vm5, %v1141_v54, 0.0  ;;  %v1085_v62 = vsel %vm1069_vm7, %v1066_v57, 0.0  ;;  %v1142_v63 = vmul.f32 %v1114_v58, %v3168_v13  ;;  %v1126_v3 = vrot.slane %v1050_v55, %v3194_v32 }
  0x7b   : > { %v1088_v1 = vsel %vm1069_vm7, %v1067_v60, 0.0  ;;  %v1068_v2 = vmul.f32 %v1052_v61, %v1052_v61  ;;  %v1143_v5 = vmul.f32 %v1118_v0, %v3168_v13  ;;  %v1122_v6 = vrot.slane %v1048_v52, %v3194_v32 }
  0x7c   : > { %1080 = vadd.xlane.f32.xlu1 %v1079_v49  ;;  %v1156_v4 = vsel %vm4167_vm5, %v1142_v63, 0.0  ;;  %v1145_v8 = vmul.f32 %v1126_v3, %v3168_v13  ;;  %v1130_v11 = vrot.slane %v1052_v61, %v3194_v32  ;;  %v3280_v63 = vstv %s1175_s5  ;;  %s1651_s5 = sadd.s32 8, %s3259_s13 }
  0x7d   : > { %v1091_v7 = vsel %vm1069_vm7, %v1068_v2, 0.0  ;;  %v1159_v9 = vsel %vm4167_vm5, %v1143_v5, 0.0  ;;  %v1144_v10 = vmul.f32 %v1122_v6, %v3168_v13  ;;  %v3292_v3 = vstv %s1495_s23  ;;  %s1652_s2 = sld [smem:[#allocation8 + %s1651_s5]]  ;;  %s2514_s23 = sshll.u32 %s2897_s25, 7 }
  0x7e   : > { %1074 = vadd.xlane.f32.xlu0 %v1073_v50  ;;  %v1165_v12 = vsel %vm4167_vm5, %v1145_v8, 0.0  ;;  %v1146_v15 = vmul.f32 %v1130_v11, %v3168_v13  ;;  %p4274_p7 = scmp.ne.s32.totalorder %s4270_s15, 0 }
  0x7f   : > { %v1162_v14 = vsel %vm4167_vm5, %v1144_v10, 0.0  ;;  %v1237_v10 = vstv %s1236_s19  ;;  %s4254_s19 = scalar_lea.vmem %s4139_s3, %s3102_s20 }
  0x80   : > { %1151 = vadd.xlane.f32.xlu1 %v1150_v53  ;;  %v1168_v16 = vsel %vm4167_vm5, %v1146_v15, 0.0 }
  0x82   : > { %1148 = vadd.xlane.f32.xlu0 %v1147_v56 }
  0x84   : > { %1154 = vadd.xlane.f32.xlu1 %v1153_v59 }
  0x86   : > { %1086 = vadd.xlane.f32.xlu0 %v1085_v62 }
  0x88   : > { %1089 = vadd.xlane.f32.xlu1 %v1088_v1  ;;  %v3284_v1 = vstv %s1335_s26  ;;  %s4020_s26 = sshll.u32 %s658_s18, 3  ;;  %s4268_s18 = scalar_lea.vmem [#allocation10], %s3096_s27 }
  0x89   : > { %s2179_s14 = scalar_lea.vmem [#allocation2], %s4020_s26 }
  0x8a   : > { %1157 = vadd.xlane.f32.xlu0 %v1156_v4  ;;  %v3294_v4 = vstv %s1186_s16  ;;  %s4271_s16 = smov %s4268_s18 }
  0x8c   : > { %1092 = vadd.xlane.f32.xlu1 %v1091_v7  ;;  %v3299_v7 = vstv %s1346_s11  ;;  %s2047_s11 = sld [smem:[#allocation5 + %s2897_s25]] }
  0x8e   : > { %1160 = vadd.xlane.f32.xlu0 %v1159_v9 }
  0x90   : > { %1166 = vadd.xlane.f32.xlu1 %v1165_v12 }
  0x92   : > { %1163 = vadd.xlane.f32.xlu0 %v1162_v14  ;;  %v1397_v14 = vstv %s1396_s6 }
  0x96   : > { %1169 = vadd.xlane.f32.xlu0 %v1168_v16 }
  0xfa   : > { %v3267_v59 = vpop.xlane.xlu1 %1097 }
 0x103   : > { %v1072_v58 = vpop.xlane.xlu0 %1071 }
 0x104   : > { %v1177_v6 = vmul.f32 %v3280_v63, %v1072_v58  ;;  %v1337_v9 = vmul.f32 %v3284_v1, %v1072_v58  ;;  %v1497_v12 = vmul.f32 %v3292_v3, %v1072_v58 }
 0x105   : > { %v1078_v61 = vpop.xlane.xlu1 %1077 }
 0x107   : > { %v3275_v60 = vpop.xlane.xlu0 %1083 }
 0x108   : > { %v3347_v58 = vmul.f32 %v3292_v3, %v3275_v60 }
 0x109   : > { %v3282_v0 = vpop.xlane.xlu1 %1080 }
 0x10b   : > { %v1075_v62 = vpop.xlane.xlu0 %1074 }
 0x10c   : > { %v1178_v2 = vmul.f32 %v3280_v63, %v1075_v62  ;;  %v1338_v5 = vmul.f32 %v3284_v1, %v1075_v62 }
 0x10d   : > { %v1152_v11 = vpop.xlane.xlu1 %1151 }
 0x10e   : > { %v1203_v15 = vrot.slane %v1178_v2, %v3194_v32  ;;  %v1189_v16 = vmul.f32 %v3294_v4, %v1152_v11 }
 0x10f   : > { %v1149_v8 = vpop.xlane.xlu0 %1148 }
 0x13e   : > { %v2545_v17 = vpop.f32.mrb[0].mxu1 }
 0x13f   : > { %v850_v18 = vpop.f32.mrb[1].mxu1 }
 0x140   : > { %v2546_v19 = vpop.f32.mrb[2].mxu1 }
 0x141   : > { %v853_v20 = vpop.f32.mrb[3].mxu1 }
 0x142   : > { %v751_v21 = vpop.f32.mrb[0].mxu0 }
 0x143   : > { %756 = vst.msk [vmem:[#allocation4] sm:$0xff] %vm755_vm8, %v751_v21  ;;  %v2540_v23 = vpop.f32.mrb[1].mxu0  ;;  %v1199_v21 = vrot.slane %v1177_v6, %v3194_v32 }
 0x144   : > { %v1188_v23 = vmul.f32 %v3294_v4, %v1149_v8 }
 0x146   : > { %v2549_v24 = vpop.f32.mrb[4].mxu1 }
 0x147   : > { %v866_v25 = vpop.f32.mrb[5].mxu1 }
 0x148   : > { %v2550_v27 = vpop.f32.mrb[6].mxu1 }
 0x149   : > { %v869_v28 = vpop.f32.mrb[7].mxu1 }
 0x14a   : > { %v767_v29 = vld [vmem:[#allocation4] sm:$0xff] }
 0x14b   : > { %980 = vrot.lane.b32.xlu1 %v767_v29, %s2917_s21  ;;  %v889_v13 = vrot.slane %v767_v29, %v3185_v26  ;;  %v882_v30 = vcombine.high %v767_v29, %v767_v29  ;;  %s3277_s21 = sld [smem:[#allocation8 + %s1493_s1]]  ;;  %v1519_v29 = vrot.slane %v1497_v12, %v3194_v32  ;;  %s4255_s1 = scalar_lea.vmem %s4140_s4, %s3102_s20 }
 0x14d   : > { %v905_v31 = vrot.slane %v889_v13, %v3185_v26  ;;  %v897_v33 = vcombine.high %v889_v13, %v889_v13  ;;  %v896_v34 = vrot.slane %v882_v30, %v3185_v26  ;;  %v3321_v13 = vmul.f32 %v1397_v14, %v3267_v59 }
 0x14e   : > { %v1500_v14 = vmul.f32 %v3292_v3, %v3282_v0 }
 0x14f   : > { %v927_v35 = vcombine.high %v905_v31, %v905_v31  ;;  %v934_v36 = vrot.slane %v905_v31, %v3194_v32  ;;  %v919_v37 = vrot.slane %v897_v33, %v3185_v26  ;;  %v912_v38 = vrot.slane %v896_v34, %v3185_v26  ;;  %v3324_v33 = vpop.xlane.xlu0 %1086 }
 0x150   : > { %v898_v39 = vcombine.high %v896_v34, %v896_v34  ;;  %v1229_v31 = vadd.f32 %v1203_v15, %v1189_v16 }
 0x151   : > { %v942_v40 = vrot.slane %v927_v35, %v3194_v32  ;;  %v3237_v41 = vadd.f32 %v934_v36, %v850_v18  ;;  %v929_v42 = vcombine.high %v919_v37, %v919_v37  ;;  %v938_v43 = vrot.slane %v919_v37, %v3194_v32  ;;  %s1506_s28 = smul.f32 %s1505_s0, %s3277_s21  ;;  %s2207_s0 = sshll.u32 %s4271_s16, 4  ;;  %s2208_s0 = int_to_ptr.vmem [resolvable:$true] %s2207_s0 }
 0x152   : > { %v928_v44 = vcombine.high %v912_v38, %v912_v38  ;;  %v950_v45 = vrot.slane %v912_v38, %v3194_v32  ;;  %v926_v46 = vrot.slane %v898_v39, %v3185_v26  ;;  %s1556_s17 = smul.f32 %s3277_s21, %s3277_s21  ;;  %v1363_v18 = vrot.slane %v1338_v5, %v3194_v32  ;;  %s4269_s21 = sld [smem:[#allocation15_spill]] }
 0x153   : > { %v3242_v47 = vadd.f32 %v2545_v17, %v942_v40  ;;  %v946_v48 = vrot.slane %v929_v42, %v3194_v32  ;;  %v3245_v49 = vadd.f32 %v938_v43, %v853_v20  ;;  %v3307_v17 = vstv %s1506_s28  ;;  %p2814_p12 = scmp.lt.s32.totalorder %s2208_s0, %s2812_s22 }
 0x154   : > { %v958_v50 = vrot.slane %v928_v44, %v3194_v32  ;;  %v3248_v51 = vadd.f32 %v950_v45, %v866_v25  ;;  %v930_v52 = vcombine.high %v926_v46, %v926_v46  ;;  %v954_v53 = vrot.slane %v926_v46, %v3194_v32 }
 0x155   : > { %v3251_v54 = vadd.f32 %v2546_v19, %v946_v48  ;;  %v1498_v19 = vmul.f32 %v3292_v3, %v1075_v62  ;;  %v1349_v20 = vmul.f32 %v3299_v7, %v1152_v11  ;;  %v1557_v25 = vstv %s1556_s17  ;;  %s4272_s17 = sld [smem:[#allocation37_spill]] }
 0x156   : > { %v3253_v55 = vadd.f32 %v2549_v24, %v958_v50  ;;  %v962_v56 = vrot.slane %v930_v52, %v3194_v32  ;;  %v3256_v26 = vadd.f32 %v954_v53, %v869_v28  ;;  %v1359_v24 = vrot.slane %v1337_v9, %v3194_v32  ;;  %v3356_v9 = vld [vmem:[%s3147_s29] sm:$0x3] }
 0x157   : > { %v1348_v28 = vmul.f32 %v3299_v7, %v1149_v8  ;;  %v1508_v30 = vmul.f32 %v3307_v17, %v1149_v8  ;;  %v1523_v34 = vrot.slane %v1498_v19, %v3194_v32  ;;  %v1389_v35 = vadd.f32 %v1363_v18, %v1349_v20  ;;  %v1155_v8 = vpop.xlane.xlu1 %1154  ;;  %4206 = vst [vmem:[#allocation28_spill] sm:$0xff] %v3356_v9 }
 0x158   : > { %4204 = vst [vmem:[#allocation26_spill] sm:$0xff] %v3253_v55  ;;  %v3261_v57 = vadd.f32 %v2550_v27, %v962_v56  ;;  %v3316_v27 = vmul.f32 %v1237_v10, %v3267_v59  ;;  %v1509_v36 = vmul.f32 %v3307_v17, %v1152_v11  ;;  %v1228_v37 = vadd.f32 %v1199_v21, %v1188_v23 }
 0x159   : > { %v2918_v38 = vmov 0   ;;  %v1179_v39 = vmul.f32 %v3280_v63, %v1078_v61  ;;  %v1339_v40 = vmul.f32 %v3284_v1, %v1078_v61  ;;  %v1388_v42 = vadd.f32 %v1359_v24, %v1348_v28 }
 0x15a   : > { %4205 = vst [vmem:[#allocation27_spill] sm:$0xff] %v3261_v57  ;;  %2656 = vset.pattern.permute.xlu1 %v2918_v38  ;;  %2657 = vset.pattern.permute.xlu0 %v2918_v38  ;;  %v3331_v43 = vmul.f32 %v1557_v25, %v3267_v59  ;;  %v1548_v44 = vadd.f32 %v1519_v29, %v1508_v30  ;;  %v4166_v52 = vsub.s32 1, %v3178_v22 }
 0x15b   : > { %v1240_v45 = vadd.f32 %v3316_v27, %v1229_v31  ;;  %v1499_v46 = vmul.f32 %v3292_v3, %v1078_v61  ;;  %v1400_v48 = vadd.f32 %v3321_v13, %v1389_v35  ;;  %v1549_v50 = vadd.f32 %v1523_v34, %v1509_v36  ;;  %v1158_v61 = vpop.xlane.xlu0 %1157 }
 0x15c   : > { %v3339_v53 = vmul.f32 %v3280_v63, %v3275_v60  ;;  %v3343_v56 = vmul.f32 %v3284_v1, %v3275_v60  ;;  %v1239_v59 = vadd.f32 %v3316_v27, %v1228_v37  ;;  %v1207_v62 = vrot.slane %v1179_v39, %v3194_v32 }
 0x15d   : > { %v1367_v2 = vrot.slane %v1339_v40, %v3194_v32  ;;  %v1180_v5 = vmul.f32 %v3280_v63, %v3282_v0  ;;  %v1399_v6 = vadd.f32 %v3321_v13, %v1388_v42  ;;  %v1340_v10 = vmul.f32 %v3284_v1, %v3282_v0  ;;  %v3400_v42 = vpop.xlane.xlu1 %1089 }
 0x15e   : > { %v1559_v60 = vadd.f32 %v3331_v43, %v1548_v44  ;;  %v3361_v11 = vmax.f32 %v1240_v45, 1e-08  ;;  %v1190_v12 = vmul.f32 %v3294_v4, %v1155_v8  ;;  %v3366_v15 = vmax.f32 %v1400_v48, 1e-08 }
 0x15f   : > { %v1560_v16 = vadd.f32 %v3331_v43, %v1549_v50  ;;  %v1350_v18 = vmul.f32 %v3299_v7, %v1155_v8  ;;  %v1215_v19 = vrot.slane %v3339_v53, %v3194_v32  ;;  %v1527_v20 = vrot.slane %v1499_v46, %v3194_v32  ;;  %v1161_v34 = vpop.xlane.xlu0 %1160 }
 0x160   : > { %v3373_v21 = vmax.f32 %v1239_v59, 1e-08  ;;  %v3378_v23 = vrot.slane %v3356_v9, %v4166_v52  ;;  %v1375_v0 = vrot.slane %v3343_v56, %v3194_v32  ;;  %v1535_v24 = vrot.slane %v3347_v58, %v3194_v32 }
 0x161   : > { %v1211_v25 = vrot.slane %v1180_v5, %v3194_v32  ;;  %v3385_v28 = vmax.f32 %v1399_v6, 1e-08  ;;  %v1371_v29 = vrot.slane %v1340_v10, %v3194_v32  ;;  %v3388_v30 = vmax.f32 %v1559_v60, 1e-08 }
 0x162   : > { %4207 = vst [vmem:[#allocation29_spill] sm:$0xff] %v3378_v23  ;;  %2664 = vrsqrt.f32 %v3361_v11  ;;  %v1230_v31 = vadd.f32 %v1207_v62, %v1190_v12  ;;  %v1531_v35 = vrot.slane %v1500_v14, %v3194_v32  ;;  %v3393_v36 = vmax.f32 %v1560_v16, 1e-08 }
 0x163   : > { %2666 = vrsqrt.f32 %v3366_v15  ;;  %v1390_v37 = vadd.f32 %v1367_v2, %v1350_v18  ;;  %v1182_v38 = vmul.f32 %v3280_v63, %v3324_v33  ;;  %v1510_v39 = vmul.f32 %v3307_v17, %v1155_v8  ;;  %v1164_v60 = vpop.xlane.xlu0 %1163 }
 0x164   : > { %2668 = vrsqrt.f32 %v3373_v21  ;;  %v1191_v40 = vmul.f32 %v3294_v4, %v1158_v61  ;;  %v1342_v45 = vmul.f32 %v3284_v1, %v3324_v33  ;;  %v1351_v46 = vmul.f32 %v3299_v7, %v1158_v61 }
 0x165   : > { %2670 = vrsqrt.f32 %v3385_v28  ;;  %v1241_v53 = vadd.f32 %v3316_v27, %v1230_v31  ;;  %v3414_v59 = vmul.f32 %v3292_v3, %v3324_v33  ;;  %v1401_v62 = vadd.f32 %v3321_v13, %v1390_v37 }
 0x166   : > { %2672 = vrsqrt.f32 %v3388_v30  ;;  %v1511_v2 = vmul.f32 %v3307_v17, %v1158_v61  ;;  %v1550_v6 = vadd.f32 %v1527_v20, %v1510_v39  ;;  %v1231_v8 = vadd.f32 %v1211_v25, %v1191_v40  ;;  %v1093_v25 = vpop.xlane.xlu1 %1092 }
 0x167   : > { %v3421_v10 = vmul.f32 %v3280_v63, %v3400_v42  ;;  %2674 = vrsqrt.f32 %v3393_v36  ;;  %v1391_v14 = vadd.f32 %v1371_v29, %v1351_v46  ;;  %v1192_v33 = vmul.f32 %v3294_v4, %v1161_v34  ;;  %v1170_v44 = vpop.xlane.xlu0 %1169 }
 0x168   : > { %v1219_v16 = vrot.slane %v1182_v38, %v3194_v32  ;;  %v1379_v61 = vrot.slane %v1342_v45, %v3194_v32  ;;  %v3428_v18 = vmax.f32 %v1241_v53, 1e-08  ;;  %v1352_v20 = vmul.f32 %v3299_v7, %v1161_v34 }
 0x169   : > { %v1539_v31 = vrot.slane %v3414_v59, %v3194_v32  ;;  %v3433_v37 = vmax.f32 %v1401_v62, 1e-08  ;;  %v1551_v39 = vadd.f32 %v1531_v35, %v1511_v2  ;;  %v1193_v40 = vmul.f32 %v3294_v4, %v1164_v60 }
 0x16a   : > { %v1561_v46 = vadd.f32 %v3331_v43, %v1550_v6  ;;  %v1242_v38 = vadd.f32 %v3316_v27, %v1231_v8  ;;  %v1223_v45 = vrot.slane %v3421_v10, %v3194_v32  ;;  %v1353_v53 = vmul.f32 %v3299_v7, %v1164_v60 }
 0x16b   : > { %v1402_v5 = vadd.f32 %v3321_v13, %v1391_v14  ;;  %v1343_v59 = vmul.f32 %v3284_v1, %v3400_v42  ;;  %v1232_v35 = vadd.f32 %v1215_v19, %v1192_v33  ;;  %v1184_v62 = vmul.f32 %v3280_v63, %v1093_v25 }
 0x16c   : > { %v2665_v29 = vpop.eup %2664  ;;  %2676 = vrsqrt.f32 %v3428_v18  ;;  %v1392_v6 = vadd.f32 %v1375_v0, %v1352_v20  ;;  %v1512_v8 = vmul.f32 %v3307_v17, %v1161_v34  ;;  %v1344_v10 = vmul.f32 %v3284_v1, %v1093_v25  ;;  %v1167_v1 = vpop.xlane.xlu1 %1166 }
 0x16d   : > { %v3441_v12 = vpop.eup %2666  ;;  %v1263_v50 = vmul.f32 %v2665_v29, %v3361_v11  ;;  %2678 = vrsqrt.f32 %v3433_v37  ;;  %v1562_v14 = vadd.f32 %v3331_v43, %v1551_v39  ;;  %v1233_v19 = vadd.f32 %v1219_v16, %v1193_v40 }
 0x16e   : > { %v2669_v2 = vpop.eup %2668  ;;  %v3457_v63 = vmax.f32 %v1561_v46, 1e-08  ;;  %v3459_v52 = vmax.f32 %v1242_v38, 1e-08  ;;  %v1393_v0 = vadd.f32 %v1379_v61, %v1353_v53  ;;  %v1513_v34 = vmul.f32 %v3307_v17, %v1164_v60 }
 0x16f   : > { %v3450_v56 = vpop.eup %2670  ;;  %vm1264_vm9 = vcmp.eq.f32.partialorder %v3361_v11, inf  ;;  %v3463_v20 = vmax.f32 %v1402_v5, 1e-08  ;;  %v1243_v29 = vadd.f32 %v3316_v27, %v1232_v35  ;;  %v1227_v48 = vrot.slane %v1184_v62, %v3194_v32 }
 0x170   : > { %v3455_v33 = vpop.eup %2672  ;;  %v1195_v16 = vmul.f32 %v3294_v4, %v1170_v44  ;;  %v1403_v39 = vadd.f32 %v3321_v13, %v1392_v6  ;;  %v1552_v40 = vadd.f32 %v1535_v24, %v1512_v8  ;;  %v1387_v61 = vrot.slane %v1344_v10, %v3194_v32 }
 0x171   : > { %v1355_v60 = vmul.f32 %v3299_v7, %v1170_v44  ;;  %v3474_v46 = vpop.eup %2674  ;;  %vm1424_vm10 = vcmp.eq.f32.partialorder %v3366_v15, inf  ;;  %v1383_v5 = vrot.slane %v1343_v59, %v3194_v32  ;;  %v1244_v38 = vadd.f32 %v3316_v27, %v1233_v19 }
 0x172   : > { %v1504_v53 = vmul.f32 %v3292_v3, %v1093_v25  ;;  %v1194_v35 = vmul.f32 %v3294_v4, %v1167_v1  ;;  %vm1257_vm11 = vcmp.eq.f32.partialorder %v3373_v21, inf  ;;  %v3482_v58 = vmax.f32 %v1562_v14, 1e-08 }
 0x173   : > { %v1404_v24 = vadd.f32 %v3321_v13, %v1393_v0  ;;  %v1553_v62 = vadd.f32 %v1539_v31, %v1513_v34  ;;  %v1354_v6 = vmul.f32 %v3299_v7, %v1167_v1  ;;  %2680 = vrsqrt.f32 %v3457_v63 }
 0x174   : > { %v1503_v59 = vmul.f32 %v3292_v3, %v3400_v42  ;;  %v3489_v8 = vmax.f32 %v1243_v29, 1e-08  ;;  %v1235_v10 = vadd.f32 %v1227_v48, %v1195_v16  ;;  %vm1417_vm12 = vcmp.eq.f32.partialorder %v3385_v28, inf }
 0x175   : > { %2682 = vrsqrt.f32 %v3459_v52  ;;  %v3493_v4 = vmax.f32 %v1403_v39, 1e-08  ;;  %v1563_v25 = vadd.f32 %v3331_v43, %v1552_v40  ;;  %v1395_v14 = vadd.f32 %v1387_v61, %v1355_v60 }
 0x176   : > { %v3496_v31 = vmax.f32 %v1244_v38, 1e-08  ;;  %v1547_v7 = vrot.slane %v1504_v53, %v3194_v32  ;;  %v1515_v19 = vmul.f32 %v3307_v17, %v1170_v44  ;;  %v1234_v0 = vadd.f32 %v1223_v45, %v1194_v35  ;;  %v2677_v3 = vpop.eup %2676 }
 0x177   : > { %2684 = vrsqrt.f32 %v3463_v20  ;;  %v3501_v42 = vmax.f32 %v1404_v24, 1e-08  ;;  %v1564_v48 = vadd.f32 %v3331_v43, %v1553_v62  ;;  %v1394_v34 = vadd.f32 %v1383_v5, %v1354_v6  ;;  %v2679_v29 = vpop.eup %2678 }
 0x178   : > { %v1543_v16 = vrot.slane %v1503_v59, %v3194_v32  ;;  %2686 = vrsqrt.f32 %v3489_v8  ;;  %v1246_v39 = vadd.f32 %v3316_v27, %v1235_v10  ;;  %v1514_v40 = vmul.f32 %v3307_v17, %v1167_v1 }
 0x179   : > { %v1256_v44 = vmul.f32 %v2669_v2, %v3373_v21  ;;  %v1423_v45 = vmul.f32 %v3441_v12, %v3366_v15  ;;  %2688 = vrsqrt.f32 %v3493_v4  ;;  %v1406_v61 = vadd.f32 %v3321_v13, %v1395_v14 }
 0x17a   : > { %v3513_v60 = vmax.f32 %v1563_v25, 1e-08  ;;  %2690 = vrsqrt.f32 %v3496_v31  ;;  %v1555_v5 = vadd.f32 %v1547_v7, %v1515_v19  ;;  %v1245_v38 = vadd.f32 %v3316_v27, %v1234_v0 }
 0x17b   : > { %v3520_v17 = vsel %vm1264_vm9, %v3361_v11, %v1263_v50  ;;  %2692 = vrsqrt.f32 %v3501_v42  ;;  %v3523_v2 = vmax.f32 %v1564_v48, 1e-08  ;;  %v1405_v12 = vadd.f32 %v3321_v13, %v1394_v34 }
 0x17c   : > { %v1416_v1 = vmul.f32 %v3450_v56, %v3385_v28  ;;  %2694 = vrsqrt.f32 %v3482_v58  ;;  %v3529_v53 = vmax.f32 %v1246_v39, 1e-08  ;;  %v1554_v35 = vadd.f32 %v1543_v16, %v1514_v40 }
 0x17d   : > { %v3534_v27 = vsel %vm1424_vm10, %v3366_v15, %v1423_v45  ;;  %vm1271_vm13 = vcmp.eq.f32.partialorder %v3428_v18, inf  ;;  %v3538_v24 = vmax.f32 %v1406_v61, 1e-08  ;;  %v2681_v13 = vpop.eup %2680  ;;  %v3543_v56 = vsel %vm1257_vm11, %v3373_v21, %v1256_v44 }
 0x17e   : > { %2696 = vrsqrt.f32 %v3513_v60  ;;  %v1566_v62 = vadd.f32 %v3331_v43, %v1555_v5  ;;  %v3547_v6 = vmax.f32 %v1245_v38, 1e-08  ;;  %vm1259_vm14 = vcmp.eq.f32.partialorder %v3373_v21, 0.0 }
 0x17f   : > { %v2683_v59 = vpop.eup %2682  ;;  %v3552_v10 = vmul.f32 %v3455_v33, %v3388_v30  ;;  %vm1431_vm15 = vcmp.eq.f32.partialorder %v3433_v37, inf  ;;  %2698 = vrsqrt.f32 %v3523_v2  ;;  %v3556_v25 = vmax.f32 %v1405_v12, 1e-08 }
 0x180   : > { %v3561_v14 = vsel %vm1417_vm12, %v3385_v28, %v1416_v1  ;;  %v1270_v7 = vmul.f32 %v2677_v3, %v3428_v18  ;;  %2700 = vrsqrt.f32 %v3529_v53  ;;  %v1565_v19 = vadd.f32 %v3331_v43, %v1554_v35 }
 0x181   : > { %v2685_v0 = vpop.eup %2684  ;;  %v3568_v33 = vmul.f32 %v3474_v46, %v3393_v36  ;;  %v1430_v48 = vmul.f32 %v2679_v29, %v3433_v37  ;;  %2702 = vrsqrt.f32 %v3538_v24  ;;  %vm1278_vm0 = vcmp.eq.f32.partialorder %v3459_v52, inf }
 0x182   : > { %v2687_v16 = vpop.eup %2686  ;;  %v3575_v3 = vmax.f32 %v1566_v62, 1e-08  ;;  %2704 = vrsqrt.f32 %v3547_v6  ;;  %vm1438_vm1 = vcmp.eq.f32.partialorder %v3463_v20, inf  ;;  %v3585_v44 = vsel %vm1271_vm13, %v3428_v18, %v1270_v7 }
 0x183   : > { %v2689_v43 = vpop.eup %2688  ;;  %2706 = vrsqrt.f32 %v3556_v25  ;;  %v1277_v45 = vmul.f32 %v2683_v59, %v3459_v52  ;;  %v3589_v5 = vmax.f32 %v1565_v19, 1e-08  ;;  %v3594_v12 = vsel %vm1431_vm15, %v3433_v37, %v1430_v48 }
 0x184   : > { %v2691_v29 = vpop.eup %2690  ;;  %v1437_v1 = vmul.f32 %v2685_v0, %v3463_v20  ;;  %vm1285_vm2 = vcmp.eq.f32.partialorder %v3489_v8, inf  ;;  %vm1577_vm3 = vcmp.eq.f32.partialorder %v3388_v30, inf  ;;  %v3601_v59 = vmul.f32 %v2681_v13, %v3457_v63 }
 0x185   : > { %v2693_v38 = vpop.eup %2692  ;;  %vm1445_vm4 = vcmp.eq.f32.partialorder %v3493_v4, inf  ;;  %2708 = vrsqrt.f32 %v3575_v3  ;;  %vm1419_vm7 = vcmp.eq.f32.partialorder %v3385_v28, 0.0  ;;  %v1284_v19 = vmul.f32 %v2687_v16, %v3489_v8 }
 0x186   : > { %v2695_v62 = vpop.eup %2694  ;;  %vm1287_vm8 = vcmp.eq.f32.partialorder %v3489_v8, 0.0  ;;  %v1444_v0 = vmul.f32 %v2689_v43, %v3493_v4  ;;  %vm1447_vm9 = vcmp.eq.f32.partialorder %v3493_v4, 0.0  ;;  %vm1605_vm10 = vcmp.eq.f32.partialorder %v3513_v60, inf }
 0x187   : > { %v3616_v61 = vsel %vm1278_vm0, %v3459_v52, %v1277_v45  ;;  %v1291_v46 = vmul.f32 %v2691_v29, %v3496_v31  ;;  %v1451_v16 = vmul.f32 %v2693_v38, %v3501_v42  ;;  %2710 = vrsqrt.f32 %v3589_v5  ;;  %v769_v29 = vld [vmem:[%s3138_s30] sm:$0x7]  ;;  %s4273_s30 = sand.u32 1, %s4269_s21  }
 0x188   : > { %v2697_v48 = vpop.eup %2696  ;;  %vm1266_vm11 = vcmp.eq.f32.partialorder %v3361_v11, 0.0  ;;  %v3625_v43 = vsel %vm1438_vm1, %v3463_v20, %v1437_v1  ;;  %v3628_v39 = vmul.f32 %v2695_v62, %v3482_v58  ;;  %vm1292_vm12 = vcmp.eq.f32.partialorder %v3496_v31, inf  ;;  %s2186_s29 = scalar_lea.sflag [#allocation6], %s4273_s30 }
 0x189   : > { %v2699_v40 = vpop.eup %2698  ;;  %vm1452_vm13 = vcmp.eq.f32.partialorder %v3501_v42, inf  ;;  %v4208_v13 = vand.u32 2147483648, %v3373_v21  ;;  %v1286_v7 = vsel %vm1285_vm2, %v3489_v8, %v1284_v19  ;;  %v1446_v34 = vsel %vm1445_vm4, %v3493_v4, %v1444_v0 }
 0x18a   : > { %v2701_v45 = vpop.eup %2700  ;;  %v1604_v50 = vmul.f32 %v2697_v48, %v3513_v60  ;;  %vm1306_vm1 = vcmp.eq.f32.partialorder %v3529_v53, inf  ;;  %v3655_v21 = vsel %vm1292_vm12, %v3496_v31, %v1291_v46  ;;  %v3664_v0 = vrot.slane %v769_v29, %v3194_v32 }
 0x18b   : > { %v1261_v1 = vsel %vm1259_vm14, %v4208_v13, %v3543_v56  ;;  %v2703_v62 = vpop.eup %2702  ;;  %v3660_v56 = vsel %vm1452_vm13, %v3501_v42, %v1451_v16  ;;  %v1611_v48 = vmul.f32 %v2699_v40, %v3523_v2  ;;  %vm1466_vm12 = vcmp.eq.f32.partialorder %v3538_v24, inf }
 0x18c   : > { %v2705_v38 = vpop.eup %2704  ;;  %vm1273_vm13 = vcmp.eq.f32.partialorder %v3428_v18, 0.0  ;;  %v1305_v16 = vmul.f32 %v2701_v45, %v3529_v53  ;;  %vm1299_vm6 = vcmp.eq.f32.partialorder %v3547_v6, inf  ;;  %vm1459_vm2 = vcmp.eq.f32.partialorder %v3556_v25, inf }
 0x18d   : > { %v2707_v13 = vpop.eup %2706  ;;  %vm1280_vm4 = vcmp.eq.f32.partialorder %v3459_v52, 0.0  ;;  %vm1440_vm14 = vcmp.eq.f32.partialorder %v3463_v20, 0.0  ;;  %vm1294_vm0 = vcmp.eq.f32.partialorder %v3496_v31, 0.0  ;;  %v1465_v40 = vmul.f32 %v2703_v62, %v3538_v24 }
 0x18e   : > { %v1298_v35 = vmul.f32 %v2705_v38, %v3547_v6  ;;  %v1633_v46 = vsub.s32 2, %v3178_v22  ;;  %v1458_v19 = vmul.f32 %v2707_v13, %v3556_v25  ;;  %v3690_v57 = vmul.f32 %v3664_v0, %v1261_v1 }
 0x18f   : > { %v2709_v9 = vpop.eup %2708  ;;  %v4209_v23 = vsub.s32 1, %v3178_v22  ;;  %v1578_v38 = vsel %vm1577_vm3, %v3388_v30, %v3552_v10  ;;  %vm1579_vm15 = vcmp.eq.f32.partialorder %v3388_v30, 0.0  ;;  %v1606_v62 = vsel %vm1605_vm10, %v3513_v60, %v1604_v50 }
 0x190   : > { %vm1607_vm5 = vcmp.eq.f32.partialorder %v3513_v60, 0.0  ;;  %v3708_v22 = vsel %vm1306_vm1, %v3529_v53, %v1305_v16  ;;  %v4212_v1 = vand.u32 2147483648, %v3489_v8  ;;  %v4213_v50 = vand.u32 2147483648, %v3493_v4 }
 0x191   : > { %v3694_v55 = vrot.slane %v769_v29, %v4209_v23  ;;  %v2711_v13 = vpop.eup %2710  ;;  %4210 = vst [vmem:[#allocation30_spill] sm:$0xff] %v3708_v22  ;;  %v4211_v23 = vand.u32 2147483648, %v3385_v28  ;;  %v3726_v16 = vsel %vm1466_vm12, %v3538_v24, %v1465_v40  ;;  %v3729_v22 = vmul.f32 %v2709_v9, %v3575_v3 }
 0x192   : > { %v1289_v32 = vsel %vm1287_vm8, %v4212_v1, %v1286_v7  ;;  %v1449_v45 = vsel %vm1447_vm9, %v4213_v50, %v1446_v34  ;;  %v1300_v28 = vsel %vm1299_vm6, %v3547_v6, %v1298_v35  ;;  %vm1461_vm3 = vcmp.eq.f32.partialorder %v3556_v25, 0.0 }
 0x193   : > { %v1421_v10 = vsel %vm1419_vm7, %v4211_v23, %v3561_v14  ;;  %v3735_v8 = vrot.slane %v769_v29, %v1633_v46  ;;  %v1460_v4 = vsel %vm1459_vm2, %v3556_v25, %v1458_v19  ;;  %v4214_v14 = vand.u32 2147483648, %v3388_v30 }
 0x194   : > { %v4215_v7 = vand.u32 2147483648, %v3513_v60  ;;  %v4216_v9 = vand.u32 2147483648, %v3361_v11  ;;  %v1618_v23 = vmul.f32 %v2711_v13, %v3589_v5  ;;  %vm1619_vm6 = vcmp.eq.f32.partialorder %v3589_v5, inf }
 0x195   : > { %v1581_v34 = vsel %vm1579_vm15, %v4214_v14, %v1578_v38  ;;  %v3752_v29 = vmul.f32 %v3694_v55, %v1421_v10  ;;  %v1319_v19 = vmul.f32 %v3664_v0, %v1289_v32  ;;  %v3756_v30 = vmul.f32 %v3694_v55, %v1449_v45 }
 0x196   : > { %v1609_v40 = vsel %vm1607_vm5, %v4215_v7, %v1606_v62  ;;  %v1268_v35 = vsel %vm1266_vm11, %v4216_v9, %v3520_v17  ;;  %vm4217_vm5 = vcmp.eq.f32.partialorder %v3393_v36, inf  ;;  %vm1586_vm7 = vcmp.eq.f32.partialorder %v3393_v36, 0.0 }
 0x197   : > { %v1585_v60 = vsel %vm4217_vm5, %v3393_v36, %v3568_v33  ;;  %vm4218_vm8 = vcmp.eq.f32.partialorder %v3457_v63, inf  ;;  %vm1593_vm9 = vcmp.eq.f32.partialorder %v3457_v63, 0.0  ;;  %v3769_v17 = vmul.f32 %v3735_v8, %v1581_v34 }
 0x198   : > { %v1592_v11 = vsel %vm4218_vm8, %v3457_v63, %v3601_v59  ;;  %v3772_v32 = vmul.f32 %v3735_v8, %v1609_v40  ;;  %v1316_v46 = vmul.f32 %v3664_v0, %v1268_v35  ;;  %v4219_v33 = vand.u32 2147483648, %v3366_v15 }
 0x199   : > { %vm4220_vm10 = vcmp.eq.f32.partialorder %v3366_v15, 0.0  ;;  %vm4221_vm11 = vcmp.eq.f32.partialorder %v3482_v58, inf  ;;  %vm1600_vm15 = vcmp.eq.f32.partialorder %v3482_v58, 0.0  ;;  %vm4222_vm1 = vcmp.eq.f32.partialorder %v3523_v2, inf }
 0x19a   : > { %v1428_v45 = vsel %vm4220_vm10, %v4219_v33, %v3534_v27  ;;  %v1599_v59 = vsel %vm4221_vm11, %v3482_v58, %v3628_v39  ;;  %v1613_v38 = vsel %vm4222_vm1, %v3523_v2, %v1611_v48  ;;  %vm1614_vm2 = vcmp.eq.f32.partialorder %v3523_v2, 0.0 }
 0x19b   : > { %vm1308_vm12 = vcmp.eq.f32.partialorder %v3529_v53, 0.0  ;;  %v4223_v62 = vand.u32 2147483648, %v3393_v36  ;;  %v4224_v15 = vand.u32 2147483648, %v3428_v18  ;;  %v4225_v39 = vand.u32 2147483648, %v3433_v37 }
 0x19c   : > { %vm4226_vm5 = vcmp.eq.f32.partialorder %v3433_v37, 0.0  ;;  %v4227_v48 = vand.u32 2147483648, %v3457_v63  ;;  %v4228_v50 = vand.u32 2147483648, %v3459_v52  ;;  %v4229_v14 = vand.u32 2147483648, %v3463_v20 }
 0x19d   : > { %v1588_v13 = vsel %vm1586_vm7, %v4223_v62, %v1585_v60  ;;  %v1275_v27 = vsel %vm1273_vm13, %v4224_v15, %v3585_v44  ;;  %v1435_v10 = vsel %vm4226_vm5, %v4225_v39, %v3594_v12  ;;  %v4230_v44 = vand.u32 2147483648, %v3496_v31  ;;  %v4238_v39 = vld [vmem:[#allocation26_spill] sm:$0xff] }
 0x19e   : > { %v1595_v1 = vsel %vm1593_vm9, %v4227_v48, %v1592_v11  ;;  %v1282_v36 = vsel %vm1280_vm4, %v4228_v50, %v3616_v61  ;;  %v1442_v18 = vsel %vm1440_vm14, %v4229_v14, %v3625_v43  ;;  %v4231_v63 = vand.u32 2147483648, %v3501_v42 }
 0x19f   : > { %v1296_v37 = vsel %vm1294_vm0, %v4230_v44, %v3655_v21  ;;  %vm4232_vm13 = vcmp.eq.f32.partialorder %v3501_v42, 0.0  ;;  %v1476_v52 = vmul.f32 %v3694_v55, %v1428_v45  ;;  %v4233_v61 = vand.u32 2147483648, %v3482_v58 }
 0x1a0   : > { %v1456_v12 = vsel %vm4232_vm13, %v4231_v63, %v3660_v56  ;;  %v4234_v20 = vand.u32 2147483648, %v3523_v2  ;;  %v4235_v7 = vand.u32 2147483648, %v3547_v6  ;;  %vm4236_vm14 = vcmp.eq.f32.partialorder %v3547_v6, 0.0  ;;  %v4241_v63 = vld [vmem:[#allocation30_spill] sm:$0xff] }
 0x1a1   : > { %v1602_v34 = vsel %vm1600_vm15, %v4233_v61, %v1599_v59  ;;  %v1636_v21 = vmul.f32 %v3735_v8, %v1588_v13  ;;  %v1317_v40 = vmul.f32 %v3664_v0, %v1275_v27  ;;  %v1477_v42 = vmul.f32 %v3694_v55, %v1435_v10 }
 0x1a2   : > { %v1616_v43 = vsel %vm1614_vm2, %v4234_v20, %v1613_v38  ;;  %v1303_v31 = vsel %vm4236_vm14, %v4235_v7, %v1300_v28  ;;  %v1637_v56 = vmul.f32 %v3735_v8, %v1595_v1  ;;  %vm1468_vm0 = vcmp.eq.f32.partialorder %v3538_v24, 0.0  ;;  %v4240_v1 = vld [vmem:[#allocation27_spill] sm:$0xff] }
 0x1a3   : > { %v1318_v58 = vmul.f32 %v3664_v0, %v1282_v36  ;;  %v1478_v2 = vmul.f32 %v3694_v55, %v1442_v18  ;;  %v1320_v9 = vmul.f32 %v3664_v0, %v1296_v37  ;;  %v1480_v35 = vmul.f32 %v3694_v55, %v1456_v12 }
 0x1a4   : > { %vm1626_vm4 = vcmp.eq.f32.partialorder %v3575_v3, inf  ;;  %v1638_v28 = vmul.f32 %v3735_v8, %v1602_v34  ;;  %v1640_v60 = vmul.f32 %v3735_v8, %v1616_v43  ;;  %v1321_v11 = vmul.f32 %v3664_v0, %v1303_v31 }
 0x1a5   : > { %v4237_v33 = vand.u32 2147483648, %v3556_v25  ;;  %v1620_v48 = vsel %vm1619_vm6, %v3589_v5, %v1618_v23  ;;  %v4239_v25 = vld [vmem:[#allocation29_spill] sm:$0xff]  ;;  %v4242_v12 = vand.u32 2147483648, %v3529_v53  ;;  %vm1628_vm6 = vcmp.eq.f32.partialorder %v3575_v3, 0.0 }
 0x1a6   : > { %vm4248_vm7 = vcmask 261120  }
 0x1a7   : > { %v1463_v45 = vsel %vm1461_vm3, %v4237_v33, %v1460_v4  ;;  %vm1621_vm3 = vcmp.eq.f32.partialorder %v3589_v5, 0.0  ;;  %v1310_v61 = vsel %vm1308_vm12, %v4242_v12, %v4241_v63  ;;  %vm4249_vm8 = vmmov %vm4248_vm7 }
 0x1a8   : > { %vm4250_vm9 = vmmov %vm4248_vm7 }
 0x1a9   : > { %vm4251_vm10 = vmmov %vm4248_vm7 }
 0x1aa   : > { %vm4252_vm11 = vmmov %vm4248_vm7 }
 0x1ab   : > { %vm4253_vm15 = vmmov %vm4248_vm7 }
 0x1ac   : > { %vm4256_vm1 = vmmov %vm4248_vm7 }
 0x1ad   : > { %vm4257_vm2 = vmmov %vm4256_vm1 }
 0x1ae   : > { %vm4258_vm12 = vmmov %vm4256_vm1 }
 0x1af   : > { %vm4259_vm5 = vmmov %vm4256_vm1 }
 0x1b0   : > { %vm4260_vm13 = vmmov %vm4256_vm1 }
 0x1b1   : > { %vm4261_vm14 = vmmov %vm4256_vm1 }
 0x1bd   : > { %v981_v6 = vpop.permute.xlu1 %980 }
 0x1be   : > { %v983_v59 = vadd.f32 %v981_v6, %v3237_v41  ;;  %v984_v38 = vadd.f32 %v981_v6, %v3245_v49  ;;  %v985_v62 = vadd.f32 %v981_v6, %v3242_v47  ;;  %v986_v13 = vadd.f32 %v981_v6, %v3251_v54 }
 0x1bf   : > { %v987_v15 = vadd.f32 %v981_v6, %v3248_v51  ;;  %v988_v27 = vadd.f32 %v981_v6, %v3256_v26  ;;  %v989_v10 = vadd.f32 %v981_v6, %v4238_v39  ;;  %v990_v54 = vadd.f32 %v981_v6, %v4240_v1  ;;  %v4246_v1 = vld [vmem:[#allocation25_spill] sm:$0xff] }
 0x1c0   : > { %v995_v4 = vadd.f32 %v4239_v25, %v983_v59  ;;  %v996_v41 = vadd.f32 %v4239_v25, %v984_v38  ;;  %v997_v49 = vadd.f32 %v4239_v25, %v985_v62  ;;  %v998_v47 = vadd.f32 %v4239_v25, %v986_v13 }
 0x1c1   : > { %v999_v51 = vadd.f32 %v4239_v25, %v987_v15  ;;  %v1000_v26 = vadd.f32 %v4239_v25, %v988_v27  ;;  %v1001_v50 = vadd.f32 %v4239_v25, %v989_v10 }
 0x1c2   : > { %v1323_v36 = vadd.f32 %v3690_v57, %v995_v4  ;;  %v1324_v14 = vadd.f32 %v1316_v46, %v996_v41  ;;  %v1325_v23 = vadd.f32 %v1317_v40, %v997_v49  ;;  %v1326_v18 = vadd.f32 %v1318_v58, %v998_v47 }
 0x1c3   : > { %v1327_v44 = vadd.f32 %v1319_v19, %v999_v51  ;;  %v1328_v37 = vadd.f32 %v1320_v9, %v1000_v26  ;;  %v1002_v57 = vadd.f32 %v4239_v25, %v990_v54  ;;  %v1329_v19 = vadd.f32 %v1321_v11, %v1001_v50  ;;  %v4247_v54 = vld [vmem:[#allocation28_spill] sm:$0xff] }
 0x1c4   : > { %v1483_v34 = vadd.f32 %v3752_v29, %v1323_v36  ;;  %v1484_v20 = vadd.f32 %v1476_v52, %v1324_v14  ;;  %v1485_v43 = vadd.f32 %v1477_v42, %v1325_v23  ;;  %v1486_v7 = vadd.f32 %v1478_v2, %v1326_v18 }
 0x1c5   : > { %v1487_v46 = vadd.f32 %v3756_v30, %v1327_v44  ;;  %v1488_v31 = vadd.f32 %v1480_v35, %v1328_v37  ;;  %v1481_v52 = vmul.f32 %v3694_v55, %v1463_v45  ;;  %v1322_v42 = vmul.f32 %v3664_v0, %v1310_v61 }
 0x1c6   : > { %v3879_v40 = vadd.f32 %v3769_v17, %v1483_v34  ;;  %v3881_v58 = vadd.f32 %v1636_v21, %v1484_v20  ;;  %v3883_v9 = vadd.f32 %v1637_v56, %v1485_v43  ;;  %v3885_v53 = vadd.f32 %v1638_v28, %v1486_v7 }
 0x1c7   : > { %v3888_v29 = vadd.f32 %v3772_v32, %v1487_v46  ;;  %v4243_v30 = vand.u32 2147483648, %v3538_v24  ;;  %v4244_v2 = vand.u32 2147483648, %v3589_v5  ;;  %v1627_v0 = vsel %vm1626_vm4, %v3575_v3, %v3729_v22 }
 0x1c8   : > { %v2496_v21 = vmul.f32 -1.442695, %v3879_v40  ;;  %v2497_v56 = vmul.f32 -1.442695, %v3881_v58  ;;  %v2498_v6 = vmul.f32 -1.442695, %v3883_v9  ;;  %v1330_v24 = vadd.f32 %v1322_v42, %v1002_v57 }
 0x1c9   : > { %v1470_v17 = vsel %vm1468_vm0, %v4243_v30, %v3726_v16  ;;  %v1623_v32 = vsel %vm1621_vm3, %v4244_v2, %v1620_v48  ;;  %v2500_v35 = vmul.f32 -1.442695, %v3888_v29  ;;  %v2499_v16 = vmul.f32 -1.442695, %v3885_v53  ;;  %vm4262_vm0 = vmmov %vm4256_vm1 }
 0x1ca   : > { %2712 = vpow2.f32 %v2496_v21  ;;  %v3911_v28 = vadd.f32 %v1640_v60, %v1488_v31  ;;  %v1489_v11 = vadd.f32 %v1481_v52, %v1329_v19  ;;  %v1641_v5 = vmul.f32 %v3735_v8, %v1623_v32  ;;  %v2046_v32 = vld [vmem:[%s4255_s1] sm:$0xff]  ;;  %vm4263_vm4 = vmmov %vm4262_vm0  ;;  %s2813_s1 = scalar_lea.vmem %s2812_s22, 256 }
 0x1cb   : > { %2714 = vpow2.f32 %v2500_v35  ;;  %v1482_v33 = vmul.f32 %v3694_v55, %v1470_v17  ;;  %v4245_v22 = vand.u32 2147483648, %v3575_v3  ;;  %v1704_v51 = vrot.slane %v4247_v54, %v4246_v1 }
 0x1cc   : > { %2716 = vpow2.f32 %v2497_v56  ;;  %v2501_v59 = vmul.f32 -1.442695, %v3911_v28  ;;  %v3918_v38 = vadd.f32 %v1641_v5, %v1489_v11  ;;  %v3939_v56 = vld [vmem:[%s4254_s19] sm:$0xff]  ;;  %v3950_v5 = vstv %s1652_s2  ;;  %s2807_s19 = scalar_lea.vmem %s2208_s0, 128 }
 0x1cd   : > { %2718 = vpow2.f32 %v2498_v6  ;;  %v1630_v45 = vsel %vm1628_vm6, %v4245_v22, %v1627_v0  ;;  %v1490_v62 = vadd.f32 %v1482_v33, %v1330_v24  ;;  %v2048_v0 = vstv %s2047_s11  ;;  %s4039_s11 = scalar_lea.hbm %s4272_s17, %s2514_s23  ;;  %p2808_p2 = scmp.ne.s32.totalorder %s2208_s0, %s2807_s19 }
 0x1ce   : > { %2720 = vpow2.f32 %v2499_v16  ;;  %v1642_v60 = vmul.f32 %v3735_v8, %v1630_v45  ;;  %v2502_v13 = vmul.f32 -1.442695, %v3918_v38  ;;  %v2049_v6 = vmul.f32 %v2048_v0, %v2046_v32  ;;  %p2815_p1 = scmp.lt.s32.totalorder %s2813_s1, %s2807_s19 }
 0x1cf   : > { %2722 = vpow2.f32 %v2501_v59  ;;  %vm2111_vm3 = vcmask 1041409   ;;  %vm2113_vm6 = vcmask 1042434   ;;  %p2809_p8 = pnand %p2808_p2, %p4274_p7 }
 0x1d0   : > { %v3922_v15 = vadd.f32 %v1642_v60, %v1490_v62  ;;  %2724 = vpow2.f32 %v2502_v13  ;;  %v1795_v62 = vmax.f32 %v3879_v40, 0.0  ;;  %v1796_v60 = vmax.f32 %v3881_v58, 0.0  ;;  %p2816_p4 = por %p2815_p1, %p2814_p12 }
 0x1d1   : > { %p2810_p11 = pneg %p2809_p8 }
 0x1d2   : > { %v2503_v3 = vmul.f32 -1.442695, %v3922_v15 }
 0x1d3   : > { %p2817_p5 = pnand %p2816_p4, %p2810_p11 }
 0x1d4   : > { %v2713_v27 = vpop.eup %2712 }
 0x1d5   : > { %v2715_v39 = vpop.eup %2714  ;;  %v1677_v55 = vadd.f32 1.0, %v2713_v27  ;;  %v1799_v27 = vmax.f32 %v3888_v29, 0.0 }
 0x1d6   : > { %v2717_v10 = vpop.eup %2716  ;;  %v1681_v48 = vadd.f32 1.0, %v2715_v39  ;;  %v1797_v39 = vmax.f32 %v3883_v9, 0.0 }
 0x1d7   : > { %v2719_v25 = vpop.eup %2718  ;;  %2726 = vrcp.f32 %v1677_v55  ;;  %v1678_v4 = vadd.f32 1.0, %v2717_v10  ;;  %v1798_v55 = vmax.f32 %v3885_v53, 0.0 }
 0x1d8   : > { %v2721_v41 = vpop.eup %2720  ;;  %2728 = vrcp.f32 %v1681_v48  ;;  %v1679_v49 = vadd.f32 1.0, %v2719_v25  ;;  %v1801_v25 = vmax.f32 %v3918_v38, 0.0 }
 0x1d9   : > { %2730 = vrcp.f32 %v1678_v4  ;;  %v1680_v8 = vadd.f32 1.0, %v2721_v41  ;;  %v2723_v47 = vpop.eup %2722 }
 0x1da   : > { %2732 = vpow2.f32 %v2503_v3  ;;  %v1682_v26 = vadd.f32 1.0, %v2723_v47  ;;  %v2725_v50 = vpop.eup %2724  ;;  %v1800_v3 = vmax.f32 %v3911_v28, 0.0  ;;  %v1802_v28 = vmax.f32 %v3922_v15, 0.0 }
 0x1db   : > { %2734 = vrcp.f32 %v1679_v49  ;;  %v1683_v37 = vadd.f32 1.0, %v2725_v50 }
 0x1dc   : > { %2736 = vrcp.f32 %v1680_v8 }
 0x1dd   : > { %2738 = vrcp.f32 %v1682_v26 }
 0x1de   : > { %2740 = vrcp.f32 %v1683_v37 }
 0x1e1   : > { %v2727_v36 = vpop.eup %2726 }
 0x1e2   : > { %v2729_v14 = vpop.eup %2728  ;;  %v1705_v23 = vmul.f32 %v2727_v36, %v1704_v51 }
 0x1e3   : > { %v2731_v18 = vpop.eup %2730  ;;  %v1709_v44 = vmul.f32 %v2729_v14, %v1704_v51 }
 0x1e4   : > { %v2733_v63 = vpop.eup %2732  ;;  %v1714_v12 = vsel %vm4248_vm7, %v1705_v23, 0.0  ;;  %v1706_v61 = vmul.f32 %v2731_v18, %v1704_v51  ;;  %vm2115_vm7 = vcmask 1043459  }
 0x1e5   : > { %v2735_v34 = vpop.eup %2734  ;;  %1715 = vadd.xlane.f32.xlu0 %v1714_v12  ;;  %v1726_v20 = vsel %vm4249_vm8, %v1709_v44, 0.0  ;;  %v1684_v43 = vadd.f32 1.0, %v2733_v63  ;;  %vm2117_vm8 = vcmask 1044484  }
 0x1e6   : > { %1727 = vadd.xlane.f32.xlu1 %v1726_v20  ;;  %v1717_v7 = vsel %vm4250_vm9, %v1706_v61, 0.0  ;;  %v1707_v57 = vmul.f32 %v2735_v34, %v1704_v51  ;;  %v2737_v46 = vpop.eup %2736  ;;  %vm4264_vm9 = vmmov %vm4262_vm0 }
 0x1e7   : > { %2742 = vrcp.f32 %v1684_v43  ;;  %v1708_v19 = vmul.f32 %v2737_v46, %v1704_v51  ;;  %v2739_v52 = vpop.eup %2738 }
 0x1e8   : > { %v1720_v31 = vsel %vm4251_vm10, %v1707_v57, 0.0  ;;  %v1710_v30 = vmul.f32 %v2739_v52, %v1704_v51  ;;  %v2741_v17 = vpop.eup %2740  ;;  %vm1881_vm10 = vcmask 7168  }
 0x1e9   : > { %1718 = vadd.xlane.f32.xlu0 %v1717_v7  ;;  %v1723_v42 = vsel %vm4252_vm11, %v1708_v19, 0.0  ;;  %v1711_v2 = vmul.f32 %v2741_v17, %v1704_v51  ;;  %vm4265_vm11 = vmmov %vm4262_vm0 }
 0x1ea   : > { %v1729_v21 = vsel %vm4253_vm15, %v1710_v30, 0.0  ;;  %vm2119_vm15 = vcmask 1045509  }
 0x1eb   : > { %v1732_v24 = vsel %vm4256_vm1, %v1711_v2, 0.0  ;;  %vm2121_vm1 = vcmask 1046534  }
 0x1ed   : > { %1721 = vadd.xlane.f32.xlu0 %v1720_v31 }
 0x1f1   : > { %1724 = vadd.xlane.f32.xlu0 %v1723_v42  ;;  %v2743_v35 = vpop.eup %2742 }
 0x1f2   : > { %v1712_v16 = vmul.f32 %v2743_v35, %v1704_v51 }
 0x1f4   : > { %v1735_v11 = vsel %vm4257_vm2, %v1712_v16, 0.0  ;;  %vm2123_vm2 = vcmask 1047559  }
 0x1f5   : > { %1730 = vadd.xlane.f32.xlu0 %v1729_v21 }
 0x1f7   : > { %1806 = vperm.xlu1 %2656, %v3939_v56  }
 0x1f9   : > { %1733 = vadd.xlane.f32.xlu0 %v1732_v24 }
 0x1fb   : > { %2052 = vperm.xlu1 %2656, %v2049_v6  }
 0x1fd   : > { %1736 = vadd.xlane.f32.xlu0 %v1735_v11 }
 0x272   : > { %v1716_v33 = vpop.xlane.xlu0 %1715 }
 0x273   : > { %v1739_v22 = vadd.f32 %v3950_v5, %v1716_v33  ;;  %v1728_v45 = vpop.xlane.xlu1 %1727 }
 0x274   : > { %v1743_v59 = vadd.f32 %v3950_v5, %v1728_v45 }
 0x275   : > { %v2504_v13 = vmul.f32 -1.442695, %v1739_v22 }
 0x276   : > { %v2508_v10 = vmul.f32 -1.442695, %v1743_v59  ;;  %v1719_v48 = vpop.xlane.xlu0 %1718 }
 0x277   : > { %2744 = vpow2.f32 %v2504_v13  ;;  %v1740_v4 = vadd.f32 %v3950_v5, %v1719_v48  ;;  %v3962_v41 = vpop.permute.xlu1 %1806 }
 0x278   : > { %2746 = vpow2.f32 %v2508_v10  ;;  %v1810_v40 = vmul.f32 %v3962_v41, %v1796_v60  ;;  %v1811_v58 = vmul.f32 %v3962_v41, %v1797_v39  ;;  %v1812_v9 = vmul.f32 %v3962_v41, %v1798_v55 }
 0x279   : > { %v2505_v29 = vmul.f32 -1.442695, %v1740_v4  ;;  %v1813_v53 = vmul.f32 %v3962_v41, %v1799_v27  ;;  %v1814_v49 = vmul.f32 %v3962_v41, %v1800_v3  ;;  %v1809_v8 = vmul.f32 %v3962_v41, %v1795_v62 }
 0x27a   : > { %v1722_v38 = vpop.xlane.xlu0 %1721  ;;  %v1824_v47 = vsel %vm4258_vm12, %v1810_v40, 0.0  ;;  %v1831_v1 = vsel %vm4259_vm5, %v1811_v58, 0.0  ;;  %v1838_v54 = vsel %vm4260_vm13, %v1812_v9, 0.0  ;;  %v3978_v14 = vmul.f32 %v3962_v41, %v1801_v25  ;;  %vm4266_vm12 = vmmov %vm4262_vm0 }
 0x27b   : > { %2748 = vpow2.f32 %v2505_v29  ;;  %v1741_v51 = vadd.f32 %v3950_v5, %v1722_v38  ;;  %v3975_v26 = vpop.permute.xlu1 %2052  ;;  %v1825_v50 = vrot.slane %v1824_v47, 4  ;;  %v1832_v36 = vrot.slane %v1831_v1, 4  ;;  %vm4267_vm5 = vmmov %vm4262_vm0 }
 0x27c   : > { %v1817_v23 = vsel %vm4261_vm14, %v1809_v8, 0.0  ;;  %v2054_v18 = vrot.slane %v3975_v26, 1  ;;  %v1839_v44 = vrot.slane %v1838_v54, 4  ;;  %v2055_v20 = vrot.slane %v3975_v26, 2 }
 0x27d   : > { %v2506_v37 = vmul.f32 -1.442695, %v1741_v51  ;;  %v1818_v63 = vrot.slane %v1817_v23, 4  ;;  %v1826_v12 = vadd.f32 %v1825_v50, %v1824_v47  ;;  %v1833_v61 = vadd.f32 %v1832_v36, %v1831_v1 }
 0x27e   : > { %v1725_v34 = vpop.xlane.xlu0 %1724  ;;  %v1840_v43 = vadd.f32 %v1839_v44, %v1838_v54  ;;  %v1845_v7 = vsel %vm4262_vm0, %v1813_v53, 0.0  ;;  %v2056_v57 = vrot.slane %v3975_v26, 3  ;;  %v1852_v17 = vsel %vm4263_vm4, %v1814_v49, 0.0 }
 0x27f   : > { %2750 = vpow2.f32 %v2506_v37  ;;  %v1742_v46 = vadd.f32 %v3950_v5, %v1725_v34  ;;  %v1819_v31 = vadd.f32 %v1818_v63, %v1817_v23  ;;  %v1827_v19 = vrot.slane %v1826_v12, 2 }
 0x280   : > { %v1834_v52 = vrot.slane %v1833_v61, 2  ;;  %v1841_v42 = vrot.slane %v1840_v43, 2  ;;  %v1846_v30 = vrot.slane %v1845_v7, 4  ;;  %v1853_v35 = vrot.slane %v1852_v17, 4 }
 0x281   : > { %v2745_v21 = vpop.eup %2744  ;;  %v2507_v2 = vmul.f32 -1.442695, %v1742_v46  ;;  %v1820_v32 = vrot.slane %v1819_v31, 2  ;;  %v1828_v0 = vadd.f32 %v1827_v19, %v1826_v12  ;;  %v2057_v51 = vrot.slane %v3975_v26, 4 }
 0x282   : > { %v2747_v6 = vpop.eup %2746  ;;  %v1771_v24 = vadd.f32 1.0, %v2745_v21  ;;  %v1731_v16 = vpop.xlane.xlu0 %1730  ;;  %v1835_v11 = vadd.f32 %v1834_v52, %v1833_v61  ;;  %v1842_v33 = vadd.f32 %v1841_v42, %v1840_v43  ;;  %v1847_v22 = vadd.f32 %v1846_v30, %v1845_v7 }
 0x283   : > { %v1775_v45 = vadd.f32 1.0, %v2747_v6  ;;  %2752 = vpow2.f32 %v2507_v2  ;;  %v1744_v59 = vadd.f32 %v3950_v5, %v1731_v16  ;;  %v1821_v62 = vadd.f32 %v1820_v32, %v1819_v31 }
 0x284   : > { %2754 = vrcp.f32 %v1771_v24  ;;  %v1829_v60 = vrot.slane %v1828_v0, 1  ;;  %v1836_v13 = vrot.slane %v1835_v11, 1  ;;  %v1843_v27 = vrot.slane %v1842_v33, 1 }
 0x285   : > { %v2749_v39 = vpop.eup %2748  ;;  %2756 = vrcp.f32 %v1775_v45  ;;  %v2509_v55 = vmul.f32 -1.442695, %v1744_v59  ;;  %v1822_v10 = vrot.slane %v1821_v62, 1  ;;  %v1848_v48 = vrot.slane %v1847_v22, 2 }
 0x286   : > { %v1772_v3 = vadd.f32 1.0, %v2749_v39  ;;  %v1734_v25 = vpop.xlane.xlu0 %1733  ;;  %v1830_v4 = vadd.f32 %v1829_v60, %v1828_v0  ;;  %v1837_v40 = vadd.f32 %v1836_v13, %v1835_v11  ;;  %v1844_v58 = vadd.f32 %v1843_v27, %v1842_v33 }
 0x287   : > { %2758 = vpow2.f32 %v2509_v55  ;;  %v1745_v9 = vadd.f32 %v3950_v5, %v1734_v25  ;;  %v1823_v29 = vadd.f32 %v1822_v10, %v1821_v62  ;;  %v1849_v53 = vadd.f32 %v1848_v48, %v1847_v22 }
 0x288   : > { %2760 = vrcp.f32 %v1772_v3  ;;  %v2070_v49 = vmul.f32 %v2054_v18, %v1830_v4  ;;  %v2071_v38 = vmul.f32 %v2055_v20, %v1837_v40  ;;  %v2072_v8 = vmul.f32 %v2056_v57, %v1844_v58 }
 0x289   : > { %v2751_v47 = vpop.eup %2750  ;;  %v2510_v1 = vmul.f32 -1.442695, %v1745_v9  ;;  %v1850_v54 = vrot.slane %v1849_v53, 1  ;;  %v1854_v50 = vadd.f32 %v1853_v35, %v1852_v17  ;;  %v2069_v44 = vmul.f32 %v3975_v26, %v1823_v29 }
 0x28a   : > { %v1773_v36 = vadd.f32 1.0, %v2751_v47  ;;  %v1737_v23 = vpop.xlane.xlu0 %1736  ;;  %v2163_v37 = vrot.slane %v2070_v49, 7  ;;  %v2165_v63 = vrot.slane %v2071_v38, 6  ;;  %v2167_v20 = vrot.slane %v2072_v8, 5 }
 0x28b   : > { %2762 = vpow2.f32 %v2510_v1  ;;  %v1746_v12 = vadd.f32 %v3950_v5, %v1737_v23  ;;  %v1851_v61 = vadd.f32 %v1850_v54, %v1849_v53  ;;  %v1855_v34 = vrot.slane %v1854_v50, 2 }
 0x28c   : > { %2764 = vrcp.f32 %v1773_v36  ;;  %v2164_v18 = vsel %vm2111_vm3, %v2163_v37, %v2069_v44  ;;  %v1859_v43 = vsel %vm4264_vm9, %v3978_v14, 0.0  ;;  %v2058_v17 = vrot.slane %v3975_v26, 5 }
 0x28d   : > { %v2753_v7 = vpop.eup %2752  ;;  %v2511_v57 = vmul.f32 -1.442695, %v1746_v12  ;;  %v2166_v46 = vsel %vm2113_vm6, %v2165_v63, %v2164_v18  ;;  %v2073_v31 = vmul.f32 %v2057_v51, %v1851_v61  ;;  %v1856_v19 = vadd.f32 %v1855_v34, %v1854_v50 }
 0x28e   : > { %v2755_v52 = vpop.eup %2754  ;;  %v1774_v42 = vadd.f32 1.0, %v2753_v7  ;;  %v2168_v30 = vsel %vm2115_vm7, %v2167_v20, %v2166_v46  ;;  %v1860_v5 = vrot.slane %v1859_v43, 4  ;;  %v1816_v35 = vmul.f32 %v3962_v41, %v1802_v28 }
 0x28f   : > { %v2757_v21 = vpop.eup %2756  ;;  %2766 = vpow2.f32 %v2511_v57  ;;  %v1873_v2 = vmul.f32 %v2755_v52, %v3939_v56  ;;  %v2169_v32 = vrot.slane %v2073_v31, 4  ;;  %v1857_v0 = vrot.slane %v1856_v19, 1 }
 0x290   : > { %2768 = vrcp.f32 %v1774_v42  ;;  %v1861_v14 = vadd.f32 %v1860_v5, %v1859_v43  ;;  %v1866_v60 = vsel %vm4265_vm11, %v1816_v35, 0.0  ;;  %v1877_v27 = vmul.f32 %v2757_v21, %v3939_v56 }
 0x291   : > { %v2759_v6 = vpop.eup %2758  ;;  %1940 = vperm.xlu0 %2657, %v1873_v2   ;;  %v2170_v24 = vsel %vm2117_vm8, %v2169_v32, %v2168_v30  ;;  %v1858_v16 = vadd.f32 %v1857_v0, %v1856_v19  ;;  %v1882_v45 = vsel %vm1881_vm10, %v1873_v2, 0.0  ;;  %v1867_v15 = vrot.slane %v1866_v60, 4 }
 0x292   : > { %v2761_v11 = vpop.eup %2760  ;;  %v1776_v33 = vadd.f32 1.0, %v2759_v6  ;;  %v1862_v22 = vrot.slane %v1861_v14, 2  ;;  %v1883_v48 = vrot.slane %v1882_v45, 4  ;;  %v2059_v40 = vrot.slane %v3975_v26, 6 }
 0x293   : > { %v1874_v59 = vmul.f32 %v2761_v11, %v3939_v56  ;;  %v2074_v62 = vmul.f32 %v2058_v17, %v1858_v16  ;;  %v1868_v9 = vadd.f32 %v1867_v15, %v1866_v60  ;;  %v1910_v50 = vsel %vm1881_vm10, %v1877_v27, 0.0 }
 0x294   : > { %2770 = vrcp.f32 %v1776_v33  ;;  %v1863_v13 = vadd.f32 %v1862_v22, %v1861_v14  ;;  %v1884_v54 = vadd.f32 %v1883_v48, %v1882_v45  ;;  %v2060_v34 = vrot.slane %v3975_v26, 7 }
 0x295   : > { %v2763_v41 = vpop.eup %2762  ;;  %v1889_v28 = vsel %vm1881_vm10, %v1874_v59, 0.0  ;;  %1945 = vperm.xlu1 %2656, %v1874_v59   ;;  %v2171_v39 = vrot.slane %v2074_v62, 3  ;;  %v1869_v8 = vrot.slane %v1868_v9, 2  ;;  %v1911_v43 = vrot.slane %v1910_v50, 4 }
 0x296   : > { %v2765_v55 = vpop.eup %2764  ;;  %v1777_v10 = vadd.f32 1.0, %v2763_v41  ;;  %v1890_v3 = vrot.slane %v1889_v28, 4  ;;  %v1864_v25 = vrot.slane %v1863_v13, 1  ;;  %v1885_v57 = vrot.slane %v1884_v54, 2 }
 0x297   : > { %v1875_v4 = vmul.f32 %v2765_v55, %v3939_v56  ;;  %v2172_v58 = vsel %vm2119_vm15, %v2171_v39, %v2170_v24  ;;  %v1870_v37 = vadd.f32 %v1869_v8, %v1868_v9  ;;  %v1912_v21 = vadd.f32 %v1911_v43, %v1910_v50 }
 0x298   : > { %2772 = vrcp.f32 %v1777_v10  ;;  %v1891_v29 = vadd.f32 %v1890_v3, %v1889_v28  ;;  %v1865_v53 = vadd.f32 %v1864_v25, %v1863_v13  ;;  %v1886_v0 = vadd.f32 %v1885_v57, %v1884_v54 }
 0x299   : > { %v2767_v49 = vpop.eup %2766  ;;  %v1896_v38 = vsel %vm1881_vm10, %v1875_v4, 0.0  ;;  %1950 = vperm.xlu1 %2656, %v1875_v4   ;;  %v1871_v61 = vrot.slane %v1870_v37, 1  ;;  %v1913_v13 = vrot.slane %v1912_v21, 2 }
 0x29a   : > { %v2769_v47 = vpop.eup %2768  ;;  %v1778_v1 = vadd.f32 1.0, %v2767_v49  ;;  %v1897_v51 = vrot.slane %v1896_v38, 4  ;;  %v1892_v23 = vrot.slane %v1891_v29, 2  ;;  %v2075_v44 = vmul.f32 %v2059_v40, %v1865_v53 }
 0x29b   : > { %v1876_v36 = vmul.f32 %v2769_v47, %v3939_v56  ;;  %v1872_v52 = vadd.f32 %v1871_v61, %v1870_v37  ;;  %v1887_v62 = vrot.slane %v1886_v0, 1  ;;  %v1914_v25 = vadd.f32 %v1913_v13, %v1912_v21 }
 0x29c   : > { %2774 = vrcp.f32 %v1778_v1  ;;  %v2173_v12 = vrot.slane %v2075_v44, 2  ;;  %v1898_v20 = vadd.f32 %v1897_v51, %v1896_v38  ;;  %v1893_v31 = vadd.f32 %v1892_v23, %v1891_v29 }
 0x29d   : > { %1960 = vperm.xlu1 %2656, %v1877_v27   ;;  %v1903_v63 = vsel %vm1881_vm10, %v1876_v36, 0.0  ;;  %1955 = vperm.xlu0 %2657, %v1876_v36   ;;  %v2076_v5 = vmul.f32 %v2060_v34, %v1872_v52  ;;  %v1888_v3 = vadd.f32 %v1887_v62, %v1886_v0  ;;  %v1915_v38 = vrot.slane %v1914_v25, 1 }
 0x29e   : > { %v2771_v18 = vpop.eup %2770  ;;  %v1904_v7 = vrot.slane %v1903_v63, 4  ;;  %v2174_v19 = vsel %vm2121_vm1, %v2173_v12, %v2172_v58  ;;  %v1894_v35 = vrot.slane %v1893_v31, 1  ;;  %v1899_v6 = vrot.slane %v1898_v20, 2 }
 0x29f   : > { %v1878_v46 = vmul.f32 %v2771_v18, %v3939_v56  ;;  %v2175_v24 = vrot.slane %v2076_v5, 1  ;;  %v1916_v54 = vadd.f32 %v1915_v38, %v1914_v25 }
 0x2a0   : > { %v1905_v42 = vadd.f32 %v1904_v7, %v1903_v63  ;;  %v1895_v15 = vadd.f32 %v1894_v35, %v1893_v31  ;;  %v1900_v27 = vadd.f32 %v1899_v6, %v1898_v20 }
 0x2a1   : > { %v1917_v30 = vsel %vm1881_vm10, %v1878_v46, 0.0  ;;  %1965 = vperm.xlu0 %2657, %v1878_v46   ;;  %v2176_v22 = vsel %vm2123_vm2, %v2175_v24, %v2174_v19 }
 0x2a2   : > { %v2773_v17 = vpop.eup %2772  ;;  %v1918_v2 = vrot.slane %v1917_v30, 4  ;;  %v1906_v32 = vrot.slane %v1905_v42, 2  ;;  %2180 = vst.msk [vmem:[%s2179_s14] sm:$0xff] %vm4266_vm12, %v2176_v22  ;;  %v1901_v58 = vrot.slane %v1900_v27, 1 }
 0x2a3   : > { %v1879_v14 = vmul.f32 %v2773_v17, %v3939_v56  ;;  %2183 = vst.msk [vmem:[%s4268_s18] sm:$0xff] %vm4267_vm5, %v2176_v22 }
 0x2a4   : > { %v1919_v16 = vadd.f32 %v1918_v2, %v1917_v30  ;;  %v1907_v11 = vadd.f32 %v1906_v32, %v1905_v42  ;;  %v1902_v49 = vadd.f32 %v1901_v58, %v1900_v27 }
 0x2a5   : > { %1970 = vperm.xlu1 %2656, %v1879_v14   ;;  %v1924_v33 = vsel %vm1881_vm10, %v1879_v14, 0.0 }
 0x2a6   : > { %v2775_v45 = vpop.eup %2774  ;;  %v1925_v59 = vrot.slane %v1924_v33, 4  ;;  %v1920_v60 = vrot.slane %v1919_v16, 2  ;;  %v1908_v28 = vrot.slane %v1907_v11, 1 }
 0x2a7   : > { %v1880_v41 = vmul.f32 %v2775_v45, %v3939_v56 }
 0x2a8   : > { %v1926_v39 = vadd.f32 %v1925_v59, %v1924_v33  ;;  %v1921_v55 = vadd.f32 %v1920_v60, %v1919_v16  ;;  %v1909_v4 = vadd.f32 %v1908_v28, %v1907_v11 }
 0x2a9   : > { %2085 = vperm.xlu1 %2656, %v1895_v15   ;;  %1975 = vperm.xlu0 %2657, %v1880_v41   ;;  %v1931_v10 = vsel %vm1881_vm10, %v1880_v41, 0.0 }
 0x2aa   : > { %v1932_v48 = vrot.slane %v1931_v10, 4  ;;  %v1922_v40 = vrot.slane %v1921_v55, 1  ;;  %v1927_v9 = vrot.slane %v1926_v39, 2 }
 0x2ac   : > { %v1933_v29 = vadd.f32 %v1932_v48, %v1931_v10  ;;  %v1923_v56 = vadd.f32 %v1922_v40, %v1921_v55  ;;  %v1928_v8 = vadd.f32 %v1927_v9, %v1926_v39 }
 0x2ad   : > { %2093 = vperm.xlu1 %2656, %v1909_v4   ;;  %2081 = vperm.xlu0 %2657, %v1888_v3  }
 0x2ae   : > { %v1934_v53 = vrot.slane %v1933_v29, 2  ;;  %v1929_v51 = vrot.slane %v1928_v8, 1 }
 0x2b0   : > { %v1935_v47 = vadd.f32 %v1934_v53, %v1933_v29  ;;  %v1930_v36 = vadd.f32 %v1929_v51, %v1928_v8 }
 0x2b1   : > { %2101 = vperm.xlu1 %2656, %v1923_v56   ;;  %2089 = vperm.xlu0 %2657, %v1902_v49  }
 0x2b2   : > { %v1936_v1 = vrot.slane %v1935_v47, 1 }
 0x2b4   : > { %v1937_v50 = vadd.f32 %v1936_v1, %v1935_v47 }
 0x2b5   : > { %2097 = vperm.xlu0 %2657, %v1916_v54  }
 0x2b6   : > { %2109 = vperm.xlu1 %2656, %v1937_v50  }
 0x2b9   : > { %2105 = vperm.xlu0 %2657, %v1930_v36  }
 0x2ba   : > { %2820 = shalt.err (!%p2817_p5)
}
 0x2bb   : > { %s2821_s25 = scalar_lea.hbm %s4039_s11, 128  ;;  %s2825_s2 = scalar_lea.hbm %s4272_s17, 256 }
 0x2bc   : > { %p2822_p6 = scmp.ne.s32.totalorder %s4039_s11, %s2821_s25  ;;  %p2826_p10 = scmp.lt.u32.totalorder %s4039_s11, %s4272_s17 }
 0x2bd   : > { %p2827_p13 = scmp.lt.u32.totalorder %s2825_s2, %s2821_s25  ;;  %p2829_p2 = scmp.lt.u32.totalorder %s2821_s25, %s4039_s11 }
 0x2be   : > { %p2823_p3 = pnand %p2822_p6, %p4274_p7 }
 0x2bf   : > { %p2828_p0 = por %p2827_p13, %p2826_p10 }
 0x2c0   : > { %p2824_p9 = pneg %p2823_p3 }
 0x2c1   : > { %p2830_p8 = por %p2829_p2, %p2828_p0 }
 0x2c3   : > { %p2831_p11 = pnand %p2830_p8, %p2824_p9 }
 0x2c5   : > { %2834 = shalt.err (!%p2831_p11)
}
 0x2c6   : > { %2566 = dma.vmem_to_hbm [thread:$0]  (%p4274_p7), %s2208_s0, 128, %s4039_s11, %s2186_s29   ;;  %v4061_v44 = vld [vmem:[%s3165_s7] sm:$0xff]  ;;  %vm4275_vm13 = vcmask 23552  }
 0x2c7   : > { %vm4276_vm14 = vmmov %vm4275_vm13  ;;  %s2044_s7 = sadd.s32 7, %s3259_s13  ;;  %s2042_s15 = sadd.s32 6, %s3259_s13 }
 0x2c8   : > { %vm4277_vm0 = vmmov %vm4275_vm13  ;;  %s2045_s21 = sld [smem:[#allocation8 + %s2044_s7]]  ;;  %s4284_s0 = scalar_lea.vmem %s4148_s12, %s3102_s20 }
 0x2c9   : > { %vm4278_vm4 = vmmov %vm4277_vm0  ;;  %s4081_s23 = sld [smem:[#allocation8 + %s2042_s15]]  ;;  %s2181_s6 = scalar_lea.vmem [#allocation3], %s4020_s26 }
 0x2ca   : > { %vm4279_vm9 = vmmov %vm4277_vm0 }
 0x2cb   : > { %vm4280_vm10 = vmmov %vm4277_vm0 }
 0x2cc   : > { %vm4281_vm11 = vmmov %vm4277_vm0 }
 0x2cd   : > { %vm4282_vm12 = vmmov %vm4277_vm0 }
 0x310   : > { %v1941_v23 = vpop.permute.xlu0 %1940 }
 0x311   : > { %v1978_v37 = vmul.f32 %v4061_v44, %v1941_v23 }
 0x313   : > { %v1986_v12 = vsel %vm4275_vm13, %v1978_v37, 0.0 }
 0x314   : > { %v1946_v63 = vpop.permute.xlu1 %1945  ;;  %v1987_v18 = vrot.slane %v1986_v12, 4 }
 0x315   : > { %v1979_v61 = vmul.f32 %v4061_v44, %v1946_v63 }
 0x316   : > { %v1988_v46 = vadd.f32 %v1987_v18, %v1986_v12 }
 0x317   : > { %v1993_v34 = vsel %vm4276_vm14, %v1979_v61, 0.0 }
 0x318   : > { %v1994_v20 = vrot.slane %v1993_v34, 4  ;;  %v1951_v43 = vpop.permute.xlu1 %1950  ;;  %v1989_v32 = vrot.slane %v1988_v46, 2 }
 0x319   : > { %v1980_v7 = vmul.f32 %v4061_v44, %v1951_v43 }
 0x31a   : > { %v1995_v31 = vadd.f32 %v1994_v20, %v1993_v34  ;;  %v1990_v45 = vadd.f32 %v1989_v32, %v1988_v46  ;;  %v2127_v34 = vstv %s2045_s21 }
 0x31b   : > { %v2000_v57 = vsel %vm4277_vm0, %v1980_v7, 0.0 }
 0x31c   : > { %v2001_v19 = vrot.slane %v2000_v57, 4  ;;  %v1961_v52 = vpop.permute.xlu1 %1960  ;;  %v1956_v42 = vpop.permute.xlu0 %1955  ;;  %v1996_v0 = vrot.slane %v1995_v31, 2  ;;  %v1991_v40 = vrot.slane %v1990_v45, 1 }
 0x31d   : > { %v1982_v30 = vmul.f32 %v4061_v44, %v1961_v52  ;;  %v1981_v5 = vmul.f32 %v4061_v44, %v1956_v42 }
 0x31e   : > { %v2002_v17 = vadd.f32 %v2001_v19, %v2000_v57  ;;  %v1997_v59 = vadd.f32 %v1996_v0, %v1995_v31  ;;  %v1992_v51 = vadd.f32 %v1991_v40, %v1990_v45 }
 0x31f   : > { %v2014_v21 = vsel %vm4278_vm4, %v1982_v30, 0.0  ;;  %v2007_v2 = vsel %vm4279_vm9, %v1981_v5, 0.0 }
 0x320   : > { %v2015_v14 = vrot.slane %v2014_v21, 4  ;;  %v1966_v35 = vpop.permute.xlu0 %1965  ;;  %v2003_v6 = vrot.slane %v2002_v17, 2  ;;  %v2008_v24 = vrot.slane %v2007_v2, 4  ;;  %v1998_v10 = vrot.slane %v1997_v59, 1 }
 0x321   : > { %v1983_v16 = vmul.f32 %v4061_v44, %v1966_v35  ;;  %v2128_v52 = vmul.f32 %v2127_v34, %v1992_v51  ;;  %v2077_v35 = vstv %s4081_s23 }
 0x322   : > { %v2016_v11 = vadd.f32 %v2015_v14, %v2014_v21  ;;  %v2009_v33 = vadd.f32 %v2008_v24, %v2007_v2  ;;  %v2004_v13 = vadd.f32 %v2003_v6, %v2002_v17  ;;  %v1999_v8 = vadd.f32 %v1998_v10, %v1997_v59 }
 0x323   : > { %v2021_v22 = vsel %vm4280_vm10, %v1983_v16, 0.0  ;;  %v2078_v59 = vmul.f32 %v4061_v44, %v2077_v35 }
 0x324   : > { %v2022_v62 = vrot.slane %v2021_v22, 4  ;;  %v1971_v60 = vpop.permute.xlu1 %1970  ;;  %v2017_v15 = vrot.slane %v2016_v11, 2  ;;  %v2010_v41 = vrot.slane %v2009_v33, 2  ;;  %v2005_v58 = vrot.slane %v2004_v13, 1 }
 0x325   : > { %v1984_v28 = vmul.f32 %v4061_v44, %v1971_v60  ;;  %v2129_v18 = vmul.f32 %v2127_v34, %v1999_v8 }
 0x326   : > { %v2023_v27 = vadd.f32 %v2022_v62, %v2021_v22  ;;  %v2011_v39 = vadd.f32 %v2010_v41, %v2009_v33  ;;  %v2018_v9 = vadd.f32 %v2017_v15, %v2016_v11  ;;  %v2006_v50 = vadd.f32 %v2005_v58, %v2004_v13 }
 0x327   : > { %v2028_v55 = vsel %vm4281_vm11, %v1984_v28, 0.0  ;;  %v2144_v32 = vsel %vm2111_vm3, %v2129_v18, %v2128_v52 }
 0x328   : > { %v2024_v48 = vrot.slane %v2023_v27, 2  ;;  %v2029_v3 = vrot.slane %v2028_v55, 4  ;;  %v2086_v25 = vpop.permute.xlu1 %2085  ;;  %v1976_v4 = vpop.permute.xlu0 %1975  ;;  %v2012_v53 = vrot.slane %v2011_v39, 1  ;;  %v2019_v36 = vrot.slane %v2018_v9, 1 }
 0x329   : > { %v1985_v29 = vmul.f32 %v4061_v44, %v1976_v4  ;;  %v2130_v46 = vmul.f32 %v2127_v34, %v2006_v50 }
 0x32a   : > { %v2025_v56 = vadd.f32 %v2024_v48, %v2023_v27  ;;  %v2030_v49 = vadd.f32 %v2029_v3, %v2028_v55  ;;  %v2013_v37 = vadd.f32 %v2012_v53, %v2011_v39  ;;  %v2020_v31 = vadd.f32 %v2019_v36, %v2018_v9 }
 0x32b   : > { %v2035_v38 = vsel %vm4282_vm12, %v1985_v29, 0.0  ;;  %v2145_v24 = vsel %vm2113_vm6, %v2130_v46, %v2144_v32 }
 0x32c   : > { %v2031_v47 = vrot.slane %v2030_v49, 2  ;;  %v2036_v1 = vrot.slane %v2035_v38, 4  ;;  %v2082_v54 = vpop.permute.xlu0 %2081  ;;  %v2094_v23 = vpop.permute.xlu1 %2093  ;;  %v2026_v63 = vrot.slane %v2025_v56, 1  ;;  %v2131_v42 = vmul.f32 %v2127_v34, %v2013_v37 }
 0x32d   : > { %v2112_v7 = vsel %vm2111_vm3, %v2086_v25, %v2082_v54  ;;  %v2132_v6 = vmul.f32 %v2127_v34, %v2020_v31  ;;  %vm4283_vm3 = vmmov %vm4277_vm0 }
 0x32e   : > { %v2032_v12 = vadd.f32 %v2031_v47, %v2030_v49  ;;  %v2037_v61 = vadd.f32 %v2036_v1, %v2035_v38  ;;  %v2027_v30 = vadd.f32 %v2026_v63, %v2025_v56  ;;  %v2146_v22 = vsel %vm2115_vm7, %v2131_v42, %v2145_v24 }
 0x32f   : > { %v2147_v15 = vsel %vm2117_vm8, %v2132_v6, %v2146_v22 }
 0x330   : > { %v2033_v20 = vrot.slane %v2032_v12, 1  ;;  %v2038_v43 = vrot.slane %v2037_v61, 2  ;;  %v2090_v57 = vpop.permute.xlu0 %2089  ;;  %v2102_v21 = vpop.permute.xlu1 %2101  ;;  %v2133_v11 = vmul.f32 %v2127_v34, %v2027_v30 }
 0x331   : > { %v2114_v19 = vsel %vm2113_vm6, %v2090_v57, %v2112_v7  ;;  %vm4285_vm6 = vmmov %vm4277_vm0 }
 0x332   : > { %v2039_v5 = vadd.f32 %v2038_v43, %v2037_v61  ;;  %v2034_v17 = vadd.f32 %v2033_v20, %v2032_v12  ;;  %v2116_v0 = vsel %vm2115_vm7, %v2094_v23, %v2114_v19  ;;  %v2148_v27 = vsel %vm2119_vm15, %v2133_v11, %v2147_v15 }
 0x334   : > { %v2040_v2 = vrot.slane %v2039_v5, 1  ;;  %v2098_v14 = vpop.permute.xlu0 %2097  ;;  %v2134_v45 = vmul.f32 %v2127_v34, %v2034_v17 }
 0x335   : > { %v2118_v16 = vsel %vm2117_vm8, %v2098_v14, %v2116_v0  ;;  %v2110_v41 = vpop.permute.xlu1 %2109 }
 0x336   : > { %v2041_v33 = vadd.f32 %v2040_v2, %v2039_v5  ;;  %v2120_v60 = vsel %vm2119_vm15, %v2102_v21, %v2118_v16  ;;  %v2149_v55 = vsel %vm2121_vm1, %v2134_v45, %v2148_v27 }
 0x338   : > { %v2135_v62 = vmul.f32 %v2127_v34, %v2041_v33  ;;  %v2106_v13 = vpop.permute.xlu0 %2105 }
 0x339   : > { %v2122_v28 = vsel %vm2121_vm1, %v2106_v13, %v2120_v60 }
 0x33a   : > { %v2124_v39 = vsel %vm2123_vm2, %v2110_v41, %v2122_v28  ;;  %v2150_v48 = vsel %vm2123_vm2, %v2135_v62, %v2149_v55 }
 0x33b   : > { %v2126_v10 = vmul.f32 %v2124_v39, %v2078_v59 }
 0x33d   : > { %v2152_v3 = vadd.f32 %v2150_v48, %v2126_v10 }
 0x33f   : > { %v2153_v44 = vmul.f32 %v2152_v3, %v3975_v26 }
 0x341   : > { %2184 = vst.msk [vmem:[%s4284_s0] sm:$0xff] %vm4283_vm3, %v2153_v44 }
 0x342   : > { %2182 = vst.msk [vmem:[%s2181_s6] sm:$0xff] %vm4285_vm6, %v2153_v44 }
 0x343 PF: > { %s4286_s28 = sld [smem:[#allocation19_spill]]  ;;  %s4287_s11 = sld [smem:[#allocation14_spill]] }
 0x344   : > { %s4288_s30 = sld [smem:[#allocation23_spill]] }
 0x349   : > { %p2583_p7 = scmp.ge.s32.totalorder %s4286_s28, 2  ;;  %s2222_s29 = sand.u32 1, %s4287_s11  }
 0x34a   : > { %p4289_p12 = scmp.ne.s32.totalorder %s4288_s30, 0  ;;  %s2223_s19 = scalar_lea.sflag [#allocation6], %s2222_s29 }
 0x34c   : > { %p2576_p1 = pnand %p2583_p7, %p4289_p12 }
 0x34e   : > { %2876 = dma.done.wait (!%p2576_p1), %s2223_s19, 128  }
 0x34f   : > { %2878 = vsyncadd (!%p2576_p1), %s2223_s19, 4294967168  ;;  %s28_s28 = sadd.s32 1, %s4286_s28   ;;  %s4290_s21 = sld [smem:[#allocation15_spill]] }
 0x350   : > { %p25_p4 = scmp.ge.s32.totalorder %s28_s28, 8   ;;  %s4291_s22 = sld [smem:[#allocation16_spill]] }
 0x351   : > { %s4292_s23 = sld [smem:[#allocation24_spill]]  ;;  %s4293_s24 = sld [smem:[#allocation17_spill]] }
 0x352   : > { %s4294_s25 = sld [smem:[#allocation18_spill]]  ;;  %s4295_s26 = sld [smem:[#allocation20_spill]] }
 0x353   : > { %s4296_s27 = sld [smem:[#allocation22_spill]]  ;;  %27 = sbr.rel (!%p25_p4) target bundleno = 15 (0xf), region = 158 }
 0x35a   :  { %2238 = vsyncpa [#allocation6], 1 }
 0x35b   :  { %2240 = vsyncpa [#allocation6 + $0x1], 1 }
 0x35c   :  { %2241 = vsyncpa [#allocation7], 1 }
 0x35d   :  { %2243 = vsyncpa [#allocation7 + $0x1], 1 }
 0x35e   :  { %2244 = vsyncpa [#allocation9], 1 }

</bundles_post_ra>
